<compile_context>
chip_gen: v5e
topology: v5e:2x2
jax: 0.10.0
libtpu: 0.0.40
codegen_flags: <defaults>
</compile_context>

<pallas_src>
import functools

import jax
import jax.numpy as jnp
from jax.experimental import pallas as pl
from jax.experimental.pallas import tpu as pltpu


def _mlp_kernel(x_ref, w1_ref, b1_ref, w2_ref, b2_ref, w3_ref, b3_ref, o_ref):
    # Whole hot path fused in one kernel: 3 MXU matmuls + VPU bias-add/ReLU.
    # Operands go to the MXU in the weight dtype (bf16 fast path); accumulate
    # in f32; epilogue (bias + ReLU) in f32; cast only on the final store.
    x = x_ref[...].astype(w1_ref.dtype)

    h1 = jnp.dot(x, w1_ref[...], preferred_element_type=jnp.float32)
    h1 = jnp.maximum(h1 + b1_ref[...].astype(jnp.float32), 0.0)
    h1 = h1.astype(w2_ref.dtype)

    h2 = jnp.dot(h1, w2_ref[...], preferred_element_type=jnp.float32)
    h2 = jnp.maximum(h2 + b2_ref[...].astype(jnp.float32), 0.0)
    h2 = h2.astype(w3_ref.dtype)

    out = jnp.dot(h2, w3_ref[...], preferred_element_type=jnp.float32)
    out = out + b3_ref[...].astype(jnp.float32)
    o_ref[...] = out.astype(o_ref.dtype)


def _round_up(n, m):
    return ((n + m - 1) // m) * m


def _const_spec(shape):
    # Grid-invariant (resident) operand: single-buffered, never re-fetched.
    return pl.BlockSpec(shape, lambda i: (0, 0), pipeline_mode=pl.Buffered(1))


@functools.partial(jax.jit, static_argnames=("block_b",))
def embedding_transformer_pallas(x, w1, b1, w2, b2, w3, b3, *, block_b=1024):
    B, D_in = x.shape
    D_h1 = w1.shape[1]
    D_h2 = w2.shape[1]
    D_out = w3.shape[1]

    # Keep activations bf16 (weight dtype) end-to-end at the HBM boundary:
    # an f32 x would double the dominant x-tile DMA traffic.
    if x.dtype != w1.dtype:
        x = x.astype(w1.dtype)

    # Batch tile: 16-row aligned (bf16 sublane packing), as large as block_b
    # allows, never larger than the (16-aligned) batch. No divisibility
    # requirement on B: Pallas masks the ragged last block's edge writes.
    block = max(16, _round_up(min(block_b, B), 16))
    grid = (pl.cdiv(B, block),)

    return pl.pallas_call(
        _mlp_kernel,
        out_shape=jax.ShapeDtypeStruct((B, D_out), x.dtype),
        grid_spec=pltpu.PrefetchScalarGridSpec(
            num_scalar_prefetch=0,
            grid=grid,
            in_specs=[
                pl.BlockSpec((block, D_in), lambda i: (i, 0)),  # x tile
                _const_spec((D_in, D_h1)),                      # W1 (resident)
                _const_spec((1, D_h1)),                         # b1
                _const_spec((D_h1, D_h2)),                      # W2
                _const_spec((1, D_h2)),                         # b2
                _const_spec((D_h2, D_out)),                     # W3
                _const_spec((1, D_out)),                        # b3
            ],
            out_specs=pl.BlockSpec((block, D_out), lambda i: (i, 0)),
        ),
        compiler_params=pltpu.CompilerParams(
            dimension_semantics=("parallel",),
        ),
    )(x, w1, b1, w2, b2, w3, b3)


def _init_linear(key, fan_in, fan_out, w_dtype=jnp.bfloat16, b_dtype=jnp.float32):
    # Deterministic init mimicking PyTorch nn.Linear default:
    # U(-1/sqrt(fan_in), +1/sqrt(fan_in)). Weights stored bf16 (MXU fast path),
    # biases kept f32 for the f32 epilogue.
    kw, kb = jax.random.split(key)
    bound = 1.0 / jnp.sqrt(jnp.asarray(fan_in, jnp.float32))
    w = jax.random.uniform(kw, (fan_in, fan_out), jnp.float32,
                           minval=-bound, maxval=bound).astype(w_dtype)
    b = jax.random.uniform(kb, (1, fan_out), jnp.float32,
                           minval=-bound, maxval=bound).astype(b_dtype)
    return w, b


def _reference(x, w1, b1, w2, b2, w3, b3):
    # Pure-JAX reference mirroring the kernel's precision path
    # (bf16 operands -> f32 accumulate -> f32 epilogue -> bf16 activations).
    f32 = jnp.float32
    xb = x.astype(w1.dtype)
    h1 = jnp.dot(xb, w1, preferred_element_type=f32)
    h1 = jnp.maximum(h1 + b1.astype(f32), 0.0).astype(w2.dtype)
    h2 = jnp.dot(h1, w2, preferred_element_type=f32)
    h2 = jnp.maximum(h2 + b2.astype(f32), 0.0).astype(w3.dtype)
    out = jnp.dot(h2, w3, preferred_element_type=f32) + b3.astype(f32)
    return out.astype(w1.dtype)


if __name__ == "__main__":
    input_dim, hidden_dim, output_dim = 512, 256, 512
    batch = 50  # deliberately not a multiple of 16: exercises the ragged-block path

    key = jax.random.PRNGKey(0)
    kx, k1, k2, k3 = jax.random.split(key, 4)

    x = jax.random.normal(kx, (batch, input_dim), jnp.float32).astype(jnp.bfloat16)
    w1, b1 = _init_linear(k1, input_dim, hidden_dim)
    w2, b2 = _init_linear(k2, hidden_dim, hidden_dim)
    w3, b3 = _init_linear(k3, hidden_dim, output_dim)

    out = embedding_transformer_pallas(x, w1, b1, w2, b2, w3, b3, block_b=1024)
    out = jax.block_until_ready(out)

    ref = _reference(x, w1, b1, w2, b2, w3, b3)
    assert out.shape == (batch, output_dim)
    assert jnp.allclose(out.astype(jnp.float32), ref.astype(jnp.float32),
                        atol=3e-2, rtol=3e-2), "mismatch vs JAX reference"

    print("KERNEL_OK")
</pallas_src>

<mosaic_0001>
module attributes {stable_mosaic.version = 11 : i64} {
  func.func @_mlp_kernel(%arg0: i32, %arg1: memref<64x512xbf16, #tpu.memory_space<vmem>>, %arg2: memref<512x256xbf16, #tpu.memory_space<vmem>>, %arg3: memref<1x256xf32, #tpu.memory_space<vmem>>, %arg4: memref<256x256xbf16, #tpu.memory_space<vmem>>, %arg5: memref<1x256xf32, #tpu.memory_space<vmem>>, %arg6: memref<256x512xbf16, #tpu.memory_space<vmem>>, %arg7: memref<1x512xf32, #tpu.memory_space<vmem>>, %arg8: memref<64x512xbf16, #tpu.memory_space<vmem>>) attributes {dimension_semantics = [#tpu.dimension_semantics<parallel>], iteration_bounds = array<i64: 1>, scalar_prefetch = 0 : i64, scratch_operands = 0 : i64, tpu.core_type = #tpu.core_type<tc>, window_params = [{transform_indices = @transform_0, window_bounds = array<i64: 64, 512>}, {pipeline_mode = #tpu.pipeline_mode<synchronous>, transform_indices = @transform_1, window_bounds = array<i64: 512, 256>}, {pipeline_mode = #tpu.pipeline_mode<synchronous>, transform_indices = @transform_2, window_bounds = array<i64: 1, 256>}, {pipeline_mode = #tpu.pipeline_mode<synchronous>, transform_indices = @transform_3, window_bounds = array<i64: 256, 256>}, {pipeline_mode = #tpu.pipeline_mode<synchronous>, transform_indices = @transform_4, window_bounds = array<i64: 1, 256>}, {pipeline_mode = #tpu.pipeline_mode<synchronous>, transform_indices = @transform_5, window_bounds = array<i64: 256, 512>}, {pipeline_mode = #tpu.pipeline_mode<synchronous>, transform_indices = @transform_6, window_bounds = array<i64: 1, 512>}, {transform_indices = @transform_7, window_bounds = array<i64: 64, 512>}]} {
    %c0 = arith.constant 0 : index
    %c0_0 = arith.constant 0 : index
    %0 = vector.load %arg1[%c0, %c0_0] : memref<64x512xbf16, #tpu.memory_space<vmem>>, vector<64x512xbf16>
    %c0_1 = arith.constant 0 : index
    %c0_2 = arith.constant 0 : index
    %1 = vector.load %arg2[%c0_1, %c0_2] : memref<512x256xbf16, #tpu.memory_space<vmem>>, vector<512x256xbf16>
    %cst = arith.constant dense<0.000000e+00> : vector<64x256xf32>
    %2 = tpu.matmul %0, %1, %cst {dimension_numbers = #tpu.dot_dimension_numbers<[1], [0], [0], [1], [0, 0, 1, 1], [], []>} : vector<64x512xbf16>, vector<512x256xbf16>, vector<64x256xf32> -> vector<64x256xf32>
    %c0_3 = arith.constant 0 : index
    %c0_4 = arith.constant 0 : index
    %3 = vector.load %arg3[%c0_3, %c0_4] : memref<1x256xf32, #tpu.memory_space<vmem>>, vector<1x256xf32>
    %4 = vector.broadcast %3 : vector<1x256xf32> to vector<64x256xf32>
    %5 = arith.addf %2, %4 : vector<64x256xf32>
    %cst_5 = arith.constant 0.000000e+00 : f32
    %6 = vector.broadcast %cst_5 : f32 to vector<64x256xf32>
    %7 = arith.maximumf %5, %6 : vector<64x256xf32>
    %8 = arith.truncf %7 : vector<64x256xf32> to vector<64x256xbf16>
    %c0_6 = arith.constant 0 : index
    %c0_7 = arith.constant 0 : index
    %9 = vector.load %arg4[%c0_6, %c0_7] : memref<256x256xbf16, #tpu.memory_space<vmem>>, vector<256x256xbf16>
    %cst_8 = arith.constant dense<0.000000e+00> : vector<64x256xf32>
    %10 = tpu.matmul %8, %9, %cst_8 {dimension_numbers = #tpu.dot_dimension_numbers<[1], [0], [0], [1], [0, 0, 1, 1], [], []>} : vector<64x256xbf16>, vector<256x256xbf16>, vector<64x256xf32> -> vector<64x256xf32>
    %c0_9 = arith.constant 0 : index
    %c0_10 = arith.constant 0 : index
    %11 = vector.load %arg5[%c0_9, %c0_10] : memref<1x256xf32, #tpu.memory_space<vmem>>, vector<1x256xf32>
    %12 = vector.broadcast %11 : vector<1x256xf32> to vector<64x256xf32>
    %13 = arith.addf %10, %12 : vector<64x256xf32>
    %cst_11 = arith.constant 0.000000e+00 : f32
    %14 = vector.broadcast %cst_11 : f32 to vector<64x256xf32>
    %15 = arith.maximumf %13, %14 : vector<64x256xf32>
    %16 = arith.truncf %15 : vector<64x256xf32> to vector<64x256xbf16>
    %c0_12 = arith.constant 0 : index
    %c0_13 = arith.constant 0 : index
    %17 = vector.load %arg6[%c0_12, %c0_13] : memref<256x512xbf16, #tpu.memory_space<vmem>>, vector<256x512xbf16>
    %cst_14 = arith.constant dense<0.000000e+00> : vector<64x512xf32>
    %18 = tpu.matmul %16, %17, %cst_14 {dimension_numbers = #tpu.dot_dimension_numbers<[1], [0], [0], [1], [0, 0, 1, 1], [], []>} : vector<64x256xbf16>, vector<256x512xbf16>, vector<64x512xf32> -> vector<64x512xf32>
    %c0_15 = arith.constant 0 : index
    %c0_16 = arith.constant 0 : index
    %19 = vector.load %arg7[%c0_15, %c0_16] : memref<1x512xf32, #tpu.memory_space<vmem>>, vector<1x512xf32>
    %20 = vector.broadcast %19 : vector<1x512xf32> to vector<64x512xf32>
    %21 = arith.addf %18, %20 : vector<64x512xf32>
    %22 = arith.truncf %21 : vector<64x512xf32> to vector<64x512xbf16>
    %c0_17 = arith.constant 0 : index
    %c0_18 = arith.constant 0 : index
    %23 = vector.load %arg8[%c0_17, %c0_18] : memref<64x512xbf16, #tpu.memory_space<vmem>>, vector<64x512xbf16>
    tpu.vector_store %arg8[%c0_17, %c0_18], %22 {strides = array<i32>} : memref<64x512xbf16, #tpu.memory_space<vmem>>, vector<64x512xbf16>,
    return
  }
  func.func @transform_0(%arg0: i32) -> (i32, i32) {
    %c0_i32 = arith.constant 0 : i32
    %c0_i32_0 = arith.constant 0 : i32
    return %arg0, %c0_i32 : i32, i32
  }
  func.func @transform_1(%arg0: i32) -> (i32, i32) {
    %c0_i32 = arith.constant 0 : i32
    %c0_i32_0 = arith.constant 0 : i32
    %c0_i32_1 = arith.constant 0 : i32
    return %c0_i32, %c0_i32_0 : i32, i32
  }
  func.func @transform_2(%arg0: i32) -> (i32, i32) {
    %c0_i32 = arith.constant 0 : i32
    %c0_i32_0 = arith.constant 0 : i32
    %c0_i32_1 = arith.constant 0 : i32
    return %c0_i32, %c0_i32_0 : i32, i32
  }
  func.func @transform_3(%arg0: i32) -> (i32, i32) {
    %c0_i32 = arith.constant 0 : i32
    %c0_i32_0 = arith.constant 0 : i32
    %c0_i32_1 = arith.constant 0 : i32
    return %c0_i32, %c0_i32_0 : i32, i32
  }
  func.func @transform_4(%arg0: i32) -> (i32, i32) {
    %c0_i32 = arith.constant 0 : i32
    %c0_i32_0 = arith.constant 0 : i32
    %c0_i32_1 = arith.constant 0 : i32
    return %c0_i32, %c0_i32_0 : i32, i32
  }
  func.func @transform_5(%arg0: i32) -> (i32, i32) {
    %c0_i32 = arith.constant 0 : i32
    %c0_i32_0 = arith.constant 0 : i32
    %c0_i32_1 = arith.constant 0 : i32
    return %c0_i32, %c0_i32_0 : i32, i32
  }
  func.func @transform_6(%arg0: i32) -> (i32, i32) {
    %c0_i32 = arith.constant 0 : i32
    %c0_i32_0 = arith.constant 0 : i32
    %c0_i32_1 = arith.constant 0 : i32
    return %c0_i32, %c0_i32_0 : i32, i32
  }
  func.func @transform_7(%arg0: i32) -> (i32, i32) {
    %c0_i32 = arith.constant 0 : i32
    %c0_i32_0 = arith.constant 0 : i32
    return %arg0, %c0_i32 : i32, i32
  }
}

</mosaic_0001>

<bundles_post_ra>
// kernel: embedding_transformer_pallas.1
= control target key start
LH: loop header
LB: loop body
LE: loop exit
PB: predicated region body
PF: predicated region fallthrough
CT: control target
= control target key end

     0   :  { %12 = vsyncpa [#allocation3], 0  ;;  %s3198_s0 = inlined_call_operand.hbm [shape: bf16[50,512], index: 0, kind: input, shape index: {}]   ;;  %s3199_s1 = inlined_call_operand.hbm [shape: bf16[512,256], index: 1, kind: input, shape index: {}]   ;;  %s3200_s2 = inlined_call_operand.hbm [shape: f32[1,256], index: 2, kind: input, shape index: {}]   ;;  %s3201_s3 = inlined_call_operand.hbm [shape: bf16[256,256], index: 3, kind: input, shape index: {}]   ;;  %s3202_s4 = inlined_call_operand.hbm [shape: f32[1,256], index: 4, kind: input, shape index: {}]   ;;  %s3203_s5 = inlined_call_operand.hbm [shape: bf16[256,512], index: 5, kind: input, shape index: {}]   ;;  %s3204_s6 = inlined_call_operand.vmem [shape: f32[1,512], index: 6, kind: input, shape index: {}]   ;;  %s3205_s7 = inlined_call_operand.hbm [shape: bf16[50,512], index: 7, kind: output, shape index: {}]  }
   0x1   :  { %13 = vsyncpa [#allocation6], 0 }
   0x2   :  { %14 = vsyncpa [#allocation9], 0 }
   0x3   :  { %15 = vsyncpa [#allocation12], 0 }
   0x4   :  { %16 = vsyncpa [#allocation4], 0  ;;  %s34_s26 = sshll.u32 %s3199_s1, 4  ;;  %s35_s26 = int_to_ptr.hbm [resolvable:$true] %s34_s26 }
   0x5   :  { %20 = vsyncadd [#allocation3], 256  ;;  %s2946_s27 = smov [#allocation5]   ;;  %s58_s8 = sshll.u32 %s3201_s3, 4  ;;  %s59_s8 = int_to_ptr.hbm [resolvable:$true] %s58_s8 }
   0x6   :  { %s36_s28 = sshll.u32 %s2946_s27, 4  ;;  %s2947_s9 = smov 128   ;;  %s37_s28 = int_to_ptr.vmem [resolvable:$true] %s36_s28 }
   0x7   :  { %s2948_s10 = smov 8   ;;  %s2949_s11 = smov [#allocation8]  }
   0x8   :  { %42 = dma.hbm_to_vmem [thread:$0]  %s35_s26, 8192, %s37_s28, [#allocation6], %s2947_s9, %s2947_s9, %s2948_s10  }
   0x9   :  { %s60_s12 = sshll.u32 %s2949_s11, 4  ;;  %s21_s15 = sshll.u32 %s3198_s0, 4  ;;  %s61_s12 = int_to_ptr.vmem [resolvable:$true] %s60_s12  ;;  %s22_s15 = int_to_ptr.hbm [resolvable:$true] %s21_s15 }
   0xa   :  { %66 = dma.hbm_to_vmem [thread:$0]  %s59_s8, 4096, %s61_s12, [#allocation9], %s2947_s9, %s2947_s9, %s2948_s10  }
   0xb   :  { %s2950_s1 = smov [#allocation2]   ;;  %s48_s3 = sshll.u32 %s3200_s2, 4  ;;  %s49_s3 = int_to_ptr.hbm [resolvable:$true] %s48_s3 }
   0xc   :  { %s23_s16 = sshll.u32 %s2950_s1, 4  ;;  %s2951_s19 = smov 256   ;;  %s24_s16 = int_to_ptr.vmem [resolvable:$true] %s23_s16 }
   0xd   :  { %s2952_s20 = smov 16   ;;  %s2953_s21 = smov [#allocation7]  }
   0xe   :  { %29 = dma.hbm_to_vmem [thread:$0]  %s22_s15, 1792, %s24_s16, [#allocation3], %s2951_s19, %s2951_s19, %s2952_s20  }
   0xf   :  { %s50_s22 = sshll.u32 %s2953_s21, 4  ;;  %s72_s24 = sshll.u32 %s3202_s4, 4  ;;  %s51_s22 = int_to_ptr.vmem [resolvable:$true] %s50_s22  ;;  %s73_s24 = int_to_ptr.hbm [resolvable:$true] %s72_s24 }
  0x10   :  { %53 = dma.hbm_to_vmem [thread:$0]  %s49_s3, 32, %s51_s22, [#allocation6]  }
  0x11   :  { %s82_s2 = sshll.u32 %s3203_s5, 4  ;;  %s2954_s27 = smov [#allocation10]   ;;  %s83_s2 = int_to_ptr.hbm [resolvable:$true] %s82_s2 }
  0x12   :  { %s74_s28 = sshll.u32 %s2954_s27, 4  ;;  %s2955_s29 = smov [#allocation11]   ;;  %s75_s28 = int_to_ptr.vmem [resolvable:$true] %s74_s28 }
  0x13   :  { %77 = dma.hbm_to_vmem [thread:$0]  %s73_s24, 32, %s75_s28, [#allocation9]  }
  0x14   :  { %s84_s30 = sshll.u32 %s2955_s29, 4  ;;  %s85_s30 = int_to_ptr.vmem [resolvable:$true] %s84_s30 }
  0x15   :  { %90 = dma.hbm_to_vmem [thread:$0]  %s83_s2, 8192, %s85_s30, [#allocation12], %s2951_s19, %s2951_s19, %s2952_s20  }
  0x16   :  { %2936 = dma.done.wait [#allocation3], 2048  }
  0x17   :  { %2937 = vsyncadd [#allocation3], 4294965248 }
  0x18   :  { %2938 = dma.done.wait [#allocation6], 8224  }
  0x19   :  { %2939 = vsyncadd [#allocation6], 4294959072 }
  0x1a   :  { %2940 = dma.done.wait [#allocation9], 4128  }
  0x1b   :  { %2941 = vsyncadd [#allocation9], 4294963168 }
  0x1c   :  { %2942 = dma.done.wait [#allocation12], 8192  }
  0x1d   :  { %2943 = vsyncadd [#allocation12], 4294959104  ;;  %v1999_v0 = vld [vmem:[#allocation5 + $0x70] sm:$0xf]  ;;  %v2612_v1 = vld [vmem:[#allocation5 + $0x74] sm:$0xf0] }
  0x1e   :  { %v2063_v2 = vld [vmem:[#allocation5 + $0xf0] sm:$0xf]  ;;  %v2000_v3 = vor.u32 %v2612_v1, %v1999_v0  ;;  %v2628_v4 = vld [vmem:[#allocation5 + $0xf4] sm:$0xf0]  ;;  %v1991_v11 = vld [vmem:[#allocation5 + $0x60] sm:$0xf] }
  0x1f   :  { %v2127_v5 = vld [vmem:[#allocation5 + $0x170] sm:$0xf]  ;;  %v2644_v6 = vld [vmem:[#allocation5 + $0x174] sm:$0xf0]  ;;  %v2064_v7 = vor.u32 %v2628_v4, %v2063_v2  ;;  %v2610_v13 = vld [vmem:[#allocation5 + $0x64] sm:$0xf0] }
  0x20   :  { %v2128_v8 = vor.u32 %v2644_v6, %v2127_v5  ;;  %v2191_v9 = vld [vmem:[#allocation5 + $0x1f0] sm:$0xf]  ;;  %v2660_v10 = vld [vmem:[#allocation5 + $0x1f4] sm:$0xf0]  ;;  %603 = vmatpush.bf16.msra.mxu0 %v2000_v3  ;;  %v2055_v14 = vld [vmem:[#allocation5 + $0xe0] sm:$0xf]  ;;  %v1992_v16 = vor.u32 %v2610_v13, %v1991_v11 }
  0x21   :  { %v2192_v12 = vor.u32 %v2660_v10, %v2191_v9  ;;  %v2626_v15 = vld [vmem:[#allocation5 + $0xe4] sm:$0xf0]  ;;  %632 = vmatpush.bf16.msra.mxu1 %v2064_v7  ;;  %v2119_v18 = vld [vmem:[#allocation5 + $0x160] sm:$0xf]  ;;  %v1983_v23 = vld [vmem:[#allocation5 + $0x50] sm:$0xf] }
  0x22   :  { %661 = vmatpush.bf16.msra.mxu2 %v2128_v8  ;;  %v2056_v17 = vor.u32 %v2626_v15, %v2055_v14  ;;  %v2642_v19 = vld [vmem:[#allocation5 + $0x164] sm:$0xf0]  ;;  %v2183_v20 = vld [vmem:[#allocation5 + $0x1e0] sm:$0xf]  ;;  %v2608_v24 = vld [vmem:[#allocation5 + $0x54] sm:$0xf0] }
  0x23   :  { %690 = vmatpush.bf16.msra.mxu3 %v2192_v12  ;;  %v2120_v21 = vor.u32 %v2642_v19, %v2119_v18  ;;  %v2658_v22 = vld [vmem:[#allocation5 + $0x1e4] sm:$0xf0]  ;;  %v2047_v26 = vld [vmem:[#allocation5 + $0xd0] sm:$0xf]  ;;  %v2624_v27 = vld [vmem:[#allocation5 + $0xd4] sm:$0xf0]  ;;  %v1984_v29 = vor.u32 %v2608_v24, %v1983_v23 }
  0x24   :  { %v2184_v25 = vor.u32 %v2658_v22, %v2183_v20  ;;  %v2111_v28 = vld [vmem:[#allocation5 + $0x150] sm:$0xf]  ;;  %604 = vmatpush.bf16.msra.mxu0 %v1992_v16  ;;  %v2640_v30 = vld [vmem:[#allocation5 + $0x154] sm:$0xf0]  ;;  %v2048_v33 = vor.u32 %v2624_v27, %v2047_v26  ;;  %v1975_v35 = vld [vmem:[#allocation5 + $0x40] sm:$0xf] }
  0x25   :  { %v2175_v31 = vld [vmem:[#allocation5 + $0x1d0] sm:$0xf]  ;;  %v2656_v32 = vld [vmem:[#allocation5 + $0x1d4] sm:$0xf0]  ;;  %633 = vmatpush.bf16.msra.mxu1 %v2056_v17  ;;  %v2112_v34 = vor.u32 %v2640_v30, %v2111_v28  ;;  %v2606_v36 = vld [vmem:[#allocation5 + $0x44] sm:$0xf0] }
  0x26   :  { %662 = vmatpush.bf16.msra.mxu2 %v2120_v21  ;;  %v2039_v37 = vld [vmem:[#allocation5 + $0xc0] sm:$0xf]  ;;  %v2176_v38 = vor.u32 %v2656_v32, %v2175_v31  ;;  %v2622_v39 = vld [vmem:[#allocation5 + $0xc4] sm:$0xf0]  ;;  %v1976_v44 = vor.u32 %v2606_v36, %v1975_v35  ;;  %v1967_v47 = vld [vmem:[#allocation5 + $0x30] sm:$0xf] }
  0x27   :  { %691 = vmatpush.bf16.msra.mxu3 %v2184_v25  ;;  %v2103_v40 = vld [vmem:[#allocation5 + $0x140] sm:$0xf]  ;;  %v2638_v41 = vld [vmem:[#allocation5 + $0x144] sm:$0xf0]  ;;  %v2040_v45 = vor.u32 %v2622_v39, %v2039_v37  ;;  %v2604_v48 = vld [vmem:[#allocation5 + $0x34] sm:$0xf0] }
  0x28   :  { %v2167_v42 = vld [vmem:[#allocation5 + $0x1c0] sm:$0xf]  ;;  %v2654_v43 = vld [vmem:[#allocation5 + $0x1c4] sm:$0xf0]  ;;  %605 = vmatpush.bf16.msra.mxu0 %v1984_v29  ;;  %v2104_v46 = vor.u32 %v2638_v41, %v2103_v40  ;;  %v2031_v49 = vld [vmem:[#allocation5 + $0xb0] sm:$0xf]  ;;  %v1968_v56 = vor.u32 %v2604_v48, %v1967_v47 }
  0x29   :  { %634 = vmatpush.bf16.msra.mxu1 %v2048_v33  ;;  %v2168_v50 = vor.u32 %v2654_v43, %v2167_v42  ;;  %v2620_v51 = vld [vmem:[#allocation5 + $0xb4] sm:$0xf0]  ;;  %v2095_v52 = vld [vmem:[#allocation5 + $0x130] sm:$0xf]  ;;  %v1959_v59 = vld [vmem:[#allocation5 + $0x20] sm:$0xf] }
  0x2a   :  { %663 = vmatpush.bf16.msra.mxu2 %v2112_v34  ;;  %v2636_v53 = vld [vmem:[#allocation5 + $0x134] sm:$0xf0]  ;;  %v2159_v54 = vld [vmem:[#allocation5 + $0x1b0] sm:$0xf]  ;;  %v2032_v57 = vor.u32 %v2620_v51, %v2031_v49  ;;  %v2602_v60 = vld [vmem:[#allocation5 + $0x24] sm:$0xf0] }
  0x2b   :  { %692 = vmatpush.bf16.msra.mxu3 %v2176_v38  ;;  %v2652_v55 = vld [vmem:[#allocation5 + $0x1b4] sm:$0xf0]  ;;  %v2096_v58 = vor.u32 %v2636_v53, %v2095_v52  ;;  %v2023_v61 = vld [vmem:[#allocation5 + $0xa0] sm:$0xf]  ;;  %v2618_v63 = vld [vmem:[#allocation5 + $0xa4] sm:$0xf0]  ;;  %v1960_v4 = vor.u32 %v2602_v60, %v1959_v59 }
  0x2c   :  { %606 = vmatpush.bf16.msra.mxu0 %v1976_v44  ;;  %v2160_v62 = vor.u32 %v2652_v55, %v2159_v54  ;;  %v2087_v0 = vld [vmem:[#allocation5 + $0x120] sm:$0xf]  ;;  %v2634_v1 = vld [vmem:[#allocation5 + $0x124] sm:$0xf0]  ;;  %v2024_v5 = vor.u32 %v2618_v63, %v2023_v61  ;;  %v1951_v7 = vld [vmem:[#allocation5 + $0x10] sm:$0xf] }
  0x2d   :  { %635 = vmatpush.bf16.msra.mxu1 %v2040_v45  ;;  %v2151_v2 = vld [vmem:[#allocation5 + $0x1a0] sm:$0xf]  ;;  %v2650_v3 = vld [vmem:[#allocation5 + $0x1a4] sm:$0xf0]  ;;  %v2088_v6 = vor.u32 %v2634_v1, %v2087_v0  ;;  %v2600_v8 = vld [vmem:[#allocation5 + $0x14] sm:$0xf0] }
  0x2e   :  { %664 = vmatpush.bf16.msra.mxu2 %v2104_v46  ;;  %v2015_v9 = vld [vmem:[#allocation5 + $0x90] sm:$0xf]  ;;  %v2152_v10 = vor.u32 %v2650_v3, %v2151_v2  ;;  %v2616_v11 = vld [vmem:[#allocation5 + $0x94] sm:$0xf0]  ;;  %v1943_v16 = vld [vmem:[#allocation5] sm:$0xf]  ;;  %v1952_v17 = vor.u32 %v2600_v8, %v1951_v7 }
  0x2f   :  { %693 = vmatpush.bf16.msra.mxu3 %v2168_v50  ;;  %v2079_v12 = vld [vmem:[#allocation5 + $0x110] sm:$0xf]  ;;  %v2632_v13 = vld [vmem:[#allocation5 + $0x114] sm:$0xf0]  ;;  %v2598_v18 = vld [vmem:[#allocation5 + $0x4] sm:$0xf0]  ;;  %v2016_v21 = vor.u32 %v2616_v11, %v2015_v9 }
  0x30   :  { %607 = vmatpush.bf16.msra.mxu0 %v1968_v56  ;;  %v2143_v14 = vld [vmem:[#allocation5 + $0x190] sm:$0xf]  ;;  %v2648_v15 = vld [vmem:[#allocation5 + $0x194] sm:$0xf0]  ;;  %v2007_v19 = vld [vmem:[#allocation5 + $0x80] sm:$0xf]  ;;  %v2080_v22 = vor.u32 %v2632_v13, %v2079_v12  ;;  %v1944_v34 = vor.u32 %v2598_v18, %v1943_v16 }
  0x31   :  { %636 = vmatpush.bf16.msra.mxu1 %v2032_v57  ;;  %v2614_v20 = vld [vmem:[#allocation5 + $0x84] sm:$0xf0]  ;;  %v2071_v23 = vld [vmem:[#allocation5 + $0x100] sm:$0xf]  ;;  %v2144_v26 = vor.u32 %v2648_v15, %v2143_v14  ;;  %v2583_v29 = vld [vmem:[#allocation2 + $0xc] sm:$0xf0] }
  0x32   :  { %665 = vmatpush.bf16.msra.mxu2 %v2096_v58  ;;  %v2630_v24 = vld [vmem:[#allocation5 + $0x104] sm:$0xf0]  ;;  %v2135_v25 = vld [vmem:[#allocation5 + $0x180] sm:$0xf]  ;;  %v2581_v30 = vld [vmem:[#allocation2 + $0x4] sm:$0xf]  ;;  %v2008_v38 = vor.u32 %v2614_v20, %v2007_v19 }
  0x33   :  { %694 = vmatpush.bf16.msra.mxu3 %v2160_v62  ;;  %v2646_v27 = vld [vmem:[#allocation5 + $0x184] sm:$0xf0]  ;;  %v1879_v28 = vld [vmem:[#allocation2] sm:$0xf]  ;;  %v1881_v31 = vld [vmem:[#allocation2 + $0x10] sm:$0xf0]  ;;  %v2072_v39 = vor.u32 %v2630_v24, %v2071_v23 }
  0x34   :  { %608 = vmatpush.bf16.msra.mxu0 %v1960_v4  ;;  %v2643_v32 = vld [vmem:[#allocation5 + $0x174] sm:$0xf]  ;;  %v2129_v33 = vld [vmem:[#allocation5 + $0x178] sm:$0xf0]  ;;  %v1887_v35 = vld [vmem:[#allocation2 + $0x8] sm:$0xf]  ;;  %v2136_v43 = vor.u32 %v2646_v27, %v2135_v25  ;;  %v3021_v48 = vor.u32 %v2583_v29, %v1879_v28  ;;  %v3023_v53 = vor.u32 %v2581_v30, %v1881_v31 }
  0x35   :  { %637 = vmatpush.bf16.msra.mxu1 %v2024_v5  ;;  %v2659_v36 = vld [vmem:[#allocation5 + $0x1f4] sm:$0xf]  ;;  %v2193_v37 = vld [vmem:[#allocation5 + $0x1f8] sm:$0xf0]  ;;  %v2584_v40 = vld [vmem:[#allocation2 + $0x14] sm:$0xf0]  ;;  %v2132_v44 = vor.u32 %v2643_v32, %v2129_v33 }
  0x36   :  { %666 = vmatpush.bf16.msra.mxu2 %v2088_v6  ;;  %v2582_v41 = vld [vmem:[#allocation2 + $0xc] sm:$0xf]  ;;  %v1889_v42 = vld [vmem:[#allocation2 + $0x18] sm:$0xf0]  ;;  %v2611_v45 = vld [vmem:[#allocation5 + $0x74] sm:$0xf]  ;;  %v2196_v49 = vor.u32 %v2659_v36, %v2193_v37  ;;  %v3025_v54 = vor.u32 %v2584_v40, %v1887_v35 }
  0x37   :  { %695 = vmatpush.bf16.msra.mxu3 %v2152_v10  ;;  %v2001_v46 = vld [vmem:[#allocation5 + $0x78] sm:$0xf0]  ;;  %v2627_v47 = vld [vmem:[#allocation5 + $0xf4] sm:$0xf]  ;;  %v2641_v51 = vld [vmem:[#allocation5 + $0x164] sm:$0xf]  ;;  %v3027_v57 = vor.u32 %v2582_v41, %v1889_v42 }
  0x38   :  { %609 = vmatpush.bf16.msra.mxu0 %v1952_v17  ;;  %v2065_v50 = vld [vmem:[#allocation5 + $0xf8] sm:$0xf0]  ;;  %v2121_v52 = vld [vmem:[#allocation5 + $0x168] sm:$0xf0]  ;;  %v2657_v55 = vld [vmem:[#allocation5 + $0x1e4] sm:$0xf]  ;;  %v2004_v58 = vor.u32 %v2611_v45, %v2001_v46 }
  0x39   :  { %638 = vmatpush.bf16.msra.mxu1 %v2016_v21  ;;  %v2185_v56 = vld [vmem:[#allocation5 + $0x1e8] sm:$0xf0]  ;;  %v2068_v59 = vor.u32 %v2627_v47, %v2065_v50  ;;  %v2124_v60 = vor.u32 %v2641_v51, %v2121_v52  ;;  %v2609_v61 = vld [vmem:[#allocation5 + $0x64] sm:$0xf]  ;;  %v2639_v2 = vld [vmem:[#allocation5 + $0x154] sm:$0xf] }
  0x3a   :  { %667 = vmatpush.bf16.msra.mxu2 %v2080_v22  ;;  %v1993_v62 = vld [vmem:[#allocation5 + $0x68] sm:$0xf0]  ;;  %v2625_v63 = vld [vmem:[#allocation5 + $0xe4] sm:$0xf]  ;;  %v2188_v0 = vor.u32 %v2657_v55, %v2185_v56  ;;  %v2113_v3 = vld [vmem:[#allocation5 + $0x158] sm:$0xf0] }
  0x3b   :  { %696 = vmatpush.bf16.msra.mxu3 %v2144_v26  ;;  %v2057_v1 = vld [vmem:[#allocation5 + $0xe8] sm:$0xf0]  ;;  %v2655_v4 = vld [vmem:[#allocation5 + $0x1d4] sm:$0xf]  ;;  %v2177_v5 = vld [vmem:[#allocation5 + $0x1d8] sm:$0xf0]  ;;  %v1996_v6 = vor.u32 %v2609_v61, %v1993_v62  ;;  %v2116_v8 = vor.u32 %v2639_v2, %v2113_v3 }
  0x3c   :  { %610 = vmatpush.bf16.msra.mxu0 %v1944_v34  ;;  %v2060_v7 = vor.u32 %v2625_v63, %v2057_v1  ;;  %v2607_v9 = vld [vmem:[#allocation5 + $0x54] sm:$0xf]  ;;  %v1985_v10 = vld [vmem:[#allocation5 + $0x58] sm:$0xf0]  ;;  %v2180_v12 = vor.u32 %v2655_v4, %v2177_v5  ;;  %v2637_v14 = vld [vmem:[#allocation5 + $0x144] sm:$0xf] }
  0x3d   :  { %639 = vmatpush.bf16.msra.mxu1 %v2008_v38  ;;  %v2623_v11 = vld [vmem:[#allocation5 + $0xd4] sm:$0xf]  ;;  %v2049_v13 = vld [vmem:[#allocation5 + $0xd8] sm:$0xf0]  ;;  %v2105_v15 = vld [vmem:[#allocation5 + $0x148] sm:$0xf0]  ;;  %v1988_v18 = vor.u32 %v2607_v9, %v1985_v10 }
  0x3e   :  { %668 = vmatpush.bf16.msra.mxu2 %v2072_v39  ;;  %v2653_v16 = vld [vmem:[#allocation5 + $0x1c4] sm:$0xf]  ;;  %v2169_v17 = vld [vmem:[#allocation5 + $0x1c8] sm:$0xf0]  ;;  %v1895_v19 = vld [vmem:[#allocation2 + $0x20] sm:$0xf]  ;;  %v2052_v21 = vor.u32 %v2623_v11, %v2049_v13  ;;  %v2108_v22 = vor.u32 %v2637_v14, %v2105_v15 }
  0x3f   :  { %697 = vmatpush.bf16.msra.mxu3 %v2136_v43  ;;  %611 = vmatmul.bf16.vlgmr.msra.gmra.mxu0 %v3021_v48  ;;  %v2587_v20 = vld [vmem:[#allocation2 + $0x2c] sm:$0xf0]  ;;  %v2605_v23 = vld [vmem:[#allocation5 + $0x44] sm:$0xf]  ;;  %v1977_v24 = vld [vmem:[#allocation5 + $0x48] sm:$0xf0]  ;;  %v2172_v28 = vor.u32 %v2653_v16, %v2169_v17 }
  0x40   :  { %640 = vmatmul.bf16.vlgmr.msra.gmra.mxu1 %v3023_v53  ;;  %719 = vmatpush.bf16.msrb.mxu0 %v2004_v58  ;;  %v2621_v25 = vld [vmem:[#allocation5 + $0xc4] sm:$0xf]  ;;  %v1897_v27 = vld [vmem:[#allocation2 + $0x30] sm:$0xf0]  ;;  %v2041_v29 = vld [vmem:[#allocation5 + $0xc8] sm:$0xf0]  ;;  %v1980_v38 = vor.u32 %v2605_v23, %v1977_v24 }
  0x41   :  { %669 = vmatmul.bf16.vlgmr.msra.gmra.mxu2 %v3025_v54  ;;  %748 = vmatpush.bf16.msrb.mxu1 %v2068_v59  ;;  %v2585_v26 = vld [vmem:[#allocation2 + $0x24] sm:$0xf]  ;;  %v2635_v30 = vld [vmem:[#allocation5 + $0x134] sm:$0xf]  ;;  %v2097_v31 = vld [vmem:[#allocation5 + $0x138] sm:$0xf0]  ;;  %v2044_v39 = vor.u32 %v2621_v25, %v2041_v29 }
  0x42   :  { %777 = vmatpush.bf16.msrb.mxu2 %v2132_v44  ;;  %698 = vmatmul.bf16.vlgmr.msra.gmra.mxu3 %v3027_v57  ;;  %v1903_v32 = vld [vmem:[#allocation2 + $0x28] sm:$0xf]  ;;  %v2651_v33 = vld [vmem:[#allocation5 + $0x1b4] sm:$0xf]  ;;  %v2161_v34 = vld [vmem:[#allocation5 + $0x1b8] sm:$0xf0]  ;;  %v2100_v40 = vor.u32 %v2635_v30, %v2097_v31  ;;  %v3033_v44 = vor.u32 %v2587_v20, %v1895_v19  ;;  %v3035_v50 = vor.u32 %v2585_v26, %v1897_v27 }
  0x43   :  { %806 = vmatpush.bf16.msrb.mxu3 %v2196_v49  ;;  %v2588_v35 = vld [vmem:[#allocation2 + $0x34] sm:$0xf0]  ;;  %v2586_v36 = vld [vmem:[#allocation2 + $0x2c] sm:$0xf]  ;;  %v1905_v37 = vld [vmem:[#allocation2 + $0x38] sm:$0xf0]  ;;  %v2164_v45 = vor.u32 %v2651_v33, %v2161_v34 }
  0x44   :  { %720 = vmatpush.bf16.msrb.mxu0 %v1996_v6  ;;  %v2603_v41 = vld [vmem:[#allocation5 + $0x34] sm:$0xf]  ;;  %v1969_v42 = vld [vmem:[#allocation5 + $0x38] sm:$0xf0]  ;;  %v2633_v47 = vld [vmem:[#allocation5 + $0x124] sm:$0xf]  ;;  %v3037_v51 = vor.u32 %v2588_v35, %v1903_v32  ;;  %v3039_v56 = vor.u32 %v2586_v36, %v1905_v37 }
  0x45   :  { %749 = vmatpush.bf16.msrb.mxu1 %v2060_v7  ;;  %v2619_v43 = vld [vmem:[#allocation5 + $0xb4] sm:$0xf]  ;;  %v2033_v46 = vld [vmem:[#allocation5 + $0xb8] sm:$0xf0]  ;;  %v2089_v49 = vld [vmem:[#allocation5 + $0x128] sm:$0xf0]  ;;  %v1972_v58 = vor.u32 %v2603_v41, %v1969_v42 }
  0x46   :  { %778 = vmatpush.bf16.msrb.mxu2 %v2124_v60  ;;  %v2649_v52 = vld [vmem:[#allocation5 + $0x1a4] sm:$0xf]  ;;  %v2153_v55 = vld [vmem:[#allocation5 + $0x1a8] sm:$0xf0]  ;;  %v2036_v59 = vor.u32 %v2619_v43, %v2033_v46  ;;  %v2092_v60 = vor.u32 %v2633_v47, %v2089_v49  ;;  %v2631_v3 = vld [vmem:[#allocation5 + $0x114] sm:$0xf] }
  0x47   :  { %807 = vmatpush.bf16.msrb.mxu3 %v2188_v0  ;;  %v2601_v61 = vld [vmem:[#allocation5 + $0x24] sm:$0xf]  ;;  %v1961_v62 = vld [vmem:[#allocation5 + $0x28] sm:$0xf0]  ;;  %v2156_v63 = vor.u32 %v2649_v52, %v2153_v55  ;;  %v2081_v4 = vld [vmem:[#allocation5 + $0x118] sm:$0xf0] }
  0x48   :  { %721 = vmatpush.bf16.msrb.mxu0 %v1988_v18  ;;  %v2617_v0 = vld [vmem:[#allocation5 + $0xa4] sm:$0xf]  ;;  %v2025_v1 = vld [vmem:[#allocation5 + $0xa8] sm:$0xf0]  ;;  %v1964_v2 = vor.u32 %v2601_v61, %v1961_v62  ;;  %v2599_v5 = vld [vmem:[#allocation5 + $0x14] sm:$0xf]  ;;  %v2084_v7 = vor.u32 %v2631_v3, %v2081_v4 }
  0x49   :  { %750 = vmatpush.bf16.msrb.mxu1 %v2052_v21  ;;  %v2028_v6 = vor.u32 %v2617_v0, %v2025_v1  ;;  %v2647_v9 = vld [vmem:[#allocation5 + $0x194] sm:$0xf]  ;;  %v2145_v10 = vld [vmem:[#allocation5 + $0x198] sm:$0xf0]  ;;  %v2629_v14 = vld [vmem:[#allocation5 + $0x104] sm:$0xf] }
  0x4a   :  { %779 = vmatpush.bf16.msrb.mxu2 %v2116_v8  ;;  %v1953_v8 = vld [vmem:[#allocation5 + $0x18] sm:$0xf0]  ;;  %v2148_v11 = vor.u32 %v2647_v9, %v2145_v10  ;;  %v2073_v15 = vld [vmem:[#allocation5 + $0x108] sm:$0xf0]  ;;  %v2645_v17 = vld [vmem:[#allocation5 + $0x184] sm:$0xf] }
  0x4b   :  { %808 = vmatpush.bf16.msrb.mxu3 %v2180_v12  ;;  %v2615_v12 = vld [vmem:[#allocation5 + $0x94] sm:$0xf]  ;;  %v2017_v13 = vld [vmem:[#allocation5 + $0x98] sm:$0xf0]  ;;  %v1956_v16 = vor.u32 %v2599_v5, %v1953_v8  ;;  %v2137_v18 = vld [vmem:[#allocation5 + $0x188] sm:$0xf0]  ;;  %v2076_v20 = vor.u32 %v2629_v14, %v2073_v15 }
  0x4c   :  { %722 = vmatpush.bf16.msrb.mxu0 %v1980_v38  ;;  %v2020_v19 = vor.u32 %v2615_v12, %v2017_v13  ;;  %v2597_v21 = vld [vmem:[#allocation5 + $0x4] sm:$0xf]  ;;  %v2140_v23 = vor.u32 %v2645_v17, %v2137_v18  ;;  %v2009_v25 = vld [vmem:[#allocation5 + $0x88] sm:$0xf0]  ;;  %v1911_v26 = vld [vmem:[#allocation2 + $0x40] sm:$0xf] }
  0x4d   :  { %751 = vmatpush.bf16.msrb.mxu1 %v2044_v39  ;;  %v2613_v24 = vld [vmem:[#allocation5 + $0x84] sm:$0xf]  ;;  %v2591_v27 = vld [vmem:[#allocation2 + $0x4c] sm:$0xf0]  ;;  %v1913_v29 = vld [vmem:[#allocation2 + $0x50] sm:$0xf0] }
  0x4e   :  { %780 = vmatpush.bf16.msrb.mxu2 %v2108_v22  ;;  %v1945_v22 = vld [vmem:[#allocation5 + $0x8] sm:$0xf0]  ;;  %v1919_v30 = vld [vmem:[#allocation2 + $0x48] sm:$0xf]  ;;  %v2592_v31 = vld [vmem:[#allocation2 + $0x54] sm:$0xf0]  ;;  %v2012_v35 = vor.u32 %v2613_v24, %v2009_v25  ;;  %v1912_v36 = vor.u32 %v2591_v27, %v1911_v26 }
  0x4f   :  { %809 = vmatpush.bf16.msrb.mxu3 %v2172_v28  ;;  %616 = vmatmul.bf16.gmra.mxu0 %v3033_v44  ;;  %v2589_v28 = vld [vmem:[#allocation2 + $0x44] sm:$0xf]  ;;  %v1948_v32 = vor.u32 %v2597_v21, %v1945_v22  ;;  %v2590_v33 = vld [vmem:[#allocation2 + $0x4c] sm:$0xf]  ;;  %v1921_v34 = vld [vmem:[#allocation2 + $0x58] sm:$0xf0]  ;;  %v1920_v38 = vor.u32 %v2592_v31, %v1919_v30 }
  0x50   :  { %645 = vmatmul.bf16.gmra.mxu1 %v3035_v50  ;;  %723 = vmatpush.bf16.msrb.mxu0 %v1972_v58  ;;  %v1916_v37 = vor.u32 %v2589_v28, %v1913_v29  ;;  %v1924_v39 = vor.u32 %v2590_v33, %v1921_v34  ;;  %v2595_v41 = vld [vmem:[#allocation2 + $0x6c] sm:$0xf0]  ;;  %v2593_v42 = vld [vmem:[#allocation2 + $0x64] sm:$0xf]  ;;  %v1929_v43 = vld [vmem:[#allocation2 + $0x70] sm:$0xf0] }
  0x51   :  { %674 = vmatmul.bf16.gmra.mxu2 %v3037_v51  ;;  %752 = vmatpush.bf16.msrb.mxu1 %v2036_v59  ;;  %v2596_v46 = vld [vmem:[#allocation2 + $0x74] sm:$0xf0]  ;;  %v2594_v47 = vld [vmem:[#allocation2 + $0x6c] sm:$0xf]  ;;  %v1937_v49 = vld [vmem:[#allocation2 + $0x78] sm:$0xf0]  ;;  %v3047_v55 = vor.u32 %v2593_v42, %v1929_v43 }
  0x52   :  { %781 = vmatpush.bf16.msrb.mxu2 %v2100_v40  ;;  %703 = vmatmul.bf16.gmra.mxu3 %v3039_v56  ;;  %v1927_v40 = vld [vmem:[#allocation2 + $0x60] sm:$0xf]  ;;  %v3051_v59 = vor.u32 %v2594_v47, %v1937_v49  ;;  %v2676_v61 = vld [vmem:[#allocation8 + $0x74] sm:$0xf0]  ;;  %v2675_v62 = vld [vmem:[#allocation8 + $0x74] sm:$0xf] }
  0x53   :  { %810 = vmatpush.bf16.msrb.mxu3 %v2164_v45  ;;  %v1935_v45 = vld [vmem:[#allocation2 + $0x68] sm:$0xf]  ;;  %v3045_v52 = vor.u32 %v2595_v41, %v1927_v40  ;;  %v2257_v0 = vld [vmem:[#allocation8 + $0x78] sm:$0xf0]  ;;  %v2671_v3 = vld [vmem:[#allocation8 + $0x54] sm:$0xf] }
  0x54   :  { %724 = vmatpush.bf16.msrb.mxu0 %v1964_v2  ;;  %v3049_v58 = vor.u32 %v2596_v46, %v1935_v45  ;;  %v2674_v1 = vld [vmem:[#allocation8 + $0x64] sm:$0xf0]  ;;  %v2673_v2 = vld [vmem:[#allocation8 + $0x64] sm:$0xf]  ;;  %v2241_v4 = vld [vmem:[#allocation8 + $0x58] sm:$0xf0] }
  0x55   :  { %753 = vmatpush.bf16.msrb.mxu1 %v2028_v6  ;;  %v2244_v5 = vor.u32 %v2671_v3, %v2241_v4  ;;  %v2231_v6 = vld [vmem:[#allocation8 + $0x40] sm:$0xf]  ;;  %v2669_v8 = vld [vmem:[#allocation8 + $0x44] sm:$0xf]  ;;  %v2233_v10 = vld [vmem:[#allocation8 + $0x48] sm:$0xf0] }
  0x56   :  { %782 = vmatpush.bf16.msrb.mxu2 %v2092_v60  ;;  %v2255_v60 = vld [vmem:[#allocation8 + $0x70] sm:$0xf]  ;;  %v2668_v13 = vld [vmem:[#allocation8 + $0x34] sm:$0xf0]  ;;  %v2667_v14 = vld [vmem:[#allocation8 + $0x34] sm:$0xf] }
  0x57   :  { %811 = vmatpush.bf16.msrb.mxu3 %v2156_v63  ;;  %v2256_v63 = vor.u32 %v2676_v61, %v2255_v60  ;;  %v2223_v12 = vld [vmem:[#allocation8 + $0x30] sm:$0xf]  ;;  %v2215_v18 = vld [vmem:[#allocation8 + $0x20] sm:$0xf]  ;;  %v2217_v22 = vld [vmem:[#allocation8 + $0x28] sm:$0xf0] }
  0x58   :  { %725 = vmatpush.bf16.msrb.mxu0 %v1956_v16  ;;  %v2224_v15 = vor.u32 %v2668_v13, %v2223_v12  ;;  %v2225_v16 = vld [vmem:[#allocation8 + $0x38] sm:$0xf0]  ;;  %v2207_v24 = vld [vmem:[#allocation8 + $0x10] sm:$0xf]  ;;  %v2664_v25 = vld [vmem:[#allocation8 + $0x14] sm:$0xf0] }
  0x59   :  { %754 = vmatpush.bf16.msrb.mxu1 %v2020_v19  ;;  %v2228_v17 = vor.u32 %v2667_v14, %v2225_v16  ;;  %v2666_v19 = vld [vmem:[#allocation8 + $0x24] sm:$0xf0]  ;;  %v2663_v26 = vld [vmem:[#allocation8 + $0x14] sm:$0xf]  ;;  %v2208_v27 = vor.u32 %v2664_v25, %v2207_v24  ;;  %v2209_v28 = vld [vmem:[#allocation8 + $0x18] sm:$0xf0] }
  0x5a   :  { %783 = vmatpush.bf16.msrb.mxu2 %v2084_v7  ;;  %v2670_v7 = vld [vmem:[#allocation8 + $0x44] sm:$0xf0]  ;;  %v2216_v21 = vor.u32 %v2666_v19, %v2215_v18  ;;  %v2212_v29 = vor.u32 %v2663_v26, %v2209_v28  ;;  %v2199_v30 = vld [vmem:[#allocation8] sm:$0xf]  ;;  %v2201_v34 = vld [vmem:[#allocation8 + $0x8] sm:$0xf0] }
  0x5b   :  { %812 = vmatpush.bf16.msrb.mxu3 %v2148_v11  ;;  %v2232_v9 = vor.u32 %v2670_v7, %v2231_v6  ;;  %v2236_v11 = vor.u32 %v2669_v8, %v2233_v10  ;;  %v2662_v31 = vld [vmem:[#allocation8 + $0x4] sm:$0xf0]  ;;  %v2692_v41 = vld [vmem:[#allocation8 + $0xf4] sm:$0xf0]  ;;  %v2689_v49 = vld [vmem:[#allocation8 + $0xe4] sm:$0xf] }
  0x5c   :  { %726 = vmatpush.bf16.msrb.mxu0 %v1948_v32  ;;  %v2661_v32 = vld [vmem:[#allocation8 + $0x4] sm:$0xf]  ;;  %v2200_v33 = vor.u32 %v2662_v31, %v2199_v30  ;;  %v2297_v14 = vld [vmem:[#allocation8 + $0xc8] sm:$0xf0]  ;;  %v2295_v16 = vld [vmem:[#allocation8 + $0xc0] sm:$0xf] }
  0x5d   :  { %755 = vmatpush.bf16.msrb.mxu1 %v2012_v35  ;;  %v2204_v35 = vor.u32 %v2661_v32, %v2201_v34  ;;  %v2685_v13 = vld [vmem:[#allocation8 + $0xc4] sm:$0xf]  ;;  %v2289_v28 = vld [vmem:[#allocation8 + $0xb8] sm:$0xf0]  ;;  %v2287_v30 = vld [vmem:[#allocation8 + $0xb0] sm:$0xf] }
  0x5e   :  { %784 = vmatpush.bf16.msrb.mxu2 %v2076_v20  ;;  %v2665_v20 = vld [vmem:[#allocation8 + $0x24] sm:$0xf]  ;;  %v2684_v31 = vld [vmem:[#allocation8 + $0xb4] sm:$0xf0] }
  0x5f   :  { %813 = vmatpush.bf16.msrb.mxu3 %v2140_v23  ;;  %621 = vmatmul.bf16.gmra.mxu0 %v1912_v36  ;;  %v2220_v23 = vor.u32 %v2665_v20, %v2217_v22 }
  0x60   :  { %650 = vmatmul.bf16.gmra.mxu1 %v1916_v37  ;;  %1057 = vmatpush.bf16.msra.mxu0 %v2256_v63 }
  0x61   :  { %679 = vmatmul.bf16.gmra.mxu2 %v1920_v38 }
  0x62   :  { %708 = vmatmul.bf16.gmra.mxu3 %v1924_v39 }
  0x6f   :  { %626 = vmatmul.bf16.gmra.mxu0 %v3045_v52 }
  0x70   :  { %655 = vmatmul.bf16.gmra.mxu1 %v3047_v55 }
  0x71   :  { %684 = vmatmul.bf16.gmra.mxu2 %v3049_v58 }
  0x72   :  { %713 = vmatmul.bf16.gmra.mxu3 %v3051_v59 }
  0x7f   :  { %727 = vmatmul.bf16.vlgmr.msrb.gmra.mxu0 %v3021_v48  ;;  %v2247_v48 = vld [vmem:[#allocation8 + $0x60] sm:$0xf] }
  0x80   :  { %756 = vmatmul.bf16.vlgmr.msrb.gmra.mxu1 %v3023_v53  ;;  %v2260_v53 = vor.u32 %v2675_v62, %v2257_v0 }
  0x81   :  { %785 = vmatmul.bf16.vlgmr.msrb.gmra.mxu2 %v3025_v54  ;;  %v2249_v54 = vld [vmem:[#allocation8 + $0x68] sm:$0xf0] }
  0x82   :  { %814 = vmatmul.bf16.vlgmr.msrb.gmra.mxu3 %v3027_v57  ;;  %v2248_v57 = vor.u32 %v2674_v1, %v2247_v48  ;;  %1115 = vmatpush.bf16.msra.mxu2 %v2260_v53 }
  0x84   :  { %1058 = vmatpush.bf16.msra.mxu0 %v2248_v57 }
  0x8f   :  { %732 = vmatmul.bf16.gmra.mxu0 %v3033_v44  ;;  %v2252_v44 = vor.u32 %v2673_v2, %v2249_v54  ;;  %v2687_v2 = vld [vmem:[#allocation8 + $0xd4] sm:$0xf]  ;;  %v2305_v54 = vld [vmem:[#allocation8 + $0xd8] sm:$0xf0] }
  0x90   :  { %761 = vmatmul.bf16.gmra.mxu1 %v3035_v50  ;;  %v2239_v50 = vld [vmem:[#allocation8 + $0x50] sm:$0xf]  ;;  %v2308_v57 = vor.u32 %v2687_v2, %v2305_v54  ;;  %v2679_v2 = vld [vmem:[#allocation8 + $0x94] sm:$0xf]  ;;  %v2273_v54 = vld [vmem:[#allocation8 + $0x98] sm:$0xf0] }
  0x91   :  { %790 = vmatmul.bf16.gmra.mxu2 %v3037_v51  ;;  %v2672_v51 = vld [vmem:[#allocation8 + $0x54] sm:$0xf0] }
  0x92   :  { %819 = vmatmul.bf16.gmra.mxu3 %v3039_v56  ;;  %1116 = vmatpush.bf16.msra.mxu2 %v2252_v44  ;;  %v2240_v56 = vor.u32 %v2672_v51, %v2239_v50  ;;  %v2303_v44 = vld [vmem:[#allocation8 + $0xd0] sm:$0xf]  ;;  %v2688_v50 = vld [vmem:[#allocation8 + $0xd4] sm:$0xf0] }
  0x93   :  { %v2304_v3 = vor.u32 %v2688_v50, %v2303_v44  ;;  %v2271_v44 = vld [vmem:[#allocation8 + $0x90] sm:$0xf]  ;;  %v2680_v50 = vld [vmem:[#allocation8 + $0x94] sm:$0xf0] }
  0x94   :  { %1059 = vmatpush.bf16.msra.mxu0 %v2240_v56 }
  0x96   :  { %1117 = vmatpush.bf16.msra.mxu2 %v2244_v5 }
  0x98   :  { %1060 = vmatpush.bf16.msra.mxu0 %v2232_v9 }
  0x9a   :  { %1118 = vmatpush.bf16.msra.mxu2 %v2236_v11 }
  0x9c   :  { %1061 = vmatpush.bf16.msra.mxu0 %v2224_v15  ;;  %v2300_v15 = vor.u32 %v2685_v13, %v2297_v14 }
  0x9e   :  { %1119 = vmatpush.bf16.msra.mxu2 %v2228_v17  ;;  %v2686_v17 = vld [vmem:[#allocation8 + $0xc4] sm:$0xf0] }
  0x9f   :  { %737 = vmatmul.bf16.gmra.mxu0 %v1912_v36  ;;  %v2691_v36 = vld [vmem:[#allocation8 + $0xf4] sm:$0xf]  ;;  %v2296_v19 = vor.u32 %v2686_v17, %v2295_v16  ;;  %v2678_v17 = vld [vmem:[#allocation8 + $0x84] sm:$0xf0] }
  0xa0   :  { %766 = vmatmul.bf16.gmra.mxu1 %v1916_v37  ;;  %1062 = vmatpush.bf16.msra.mxu0 %v2216_v21  ;;  %v2321_v37 = vld [vmem:[#allocation8 + $0xf8] sm:$0xf0] }
  0xa1   :  { %795 = vmatmul.bf16.gmra.mxu2 %v1920_v38  ;;  %v2319_v38 = vld [vmem:[#allocation8 + $0xf0] sm:$0xf]  ;;  %v2324_v40 = vor.u32 %v2691_v36, %v2321_v37 }
  0xa2   :  { %824 = vmatmul.bf16.gmra.mxu3 %v1924_v39  ;;  %1120 = vmatpush.bf16.msra.mxu2 %v2220_v23  ;;  %v3069_v39 = vld [vmem:[#allocation7] sm:$0x3]  ;;  %v2320_v42 = vor.u32 %v2692_v41, %v2319_v38 }
  0xa3   :  { %1144 = vmatpush.bf16.msra.mxu3 %v2324_v40  ;;  %v3072_v43 = vperm.slane %v3069_v39, 0 }
  0xa4   :  { %1063 = vmatpush.bf16.msra.mxu0 %v2208_v27  ;;  %1086 = vmatpush.bf16.msra.mxu1 %v2320_v42  ;;  %v2683_v27 = vld [vmem:[#allocation8 + $0xb4] sm:$0xf] }
  0xa6   :  { %1121 = vmatpush.bf16.msra.mxu2 %v2212_v29  ;;  %v2292_v29 = vor.u32 %v2683_v27, %v2289_v28 }
  0xa8   :  { %1064 = vmatpush.bf16.msra.mxu0 %v2200_v33  ;;  %v2288_v33 = vor.u32 %v2684_v31, %v2287_v30 }
  0xaa   :  { %1122 = vmatpush.bf16.msra.mxu2 %v2204_v35 }
  0xaf   :  { %742 = vmatmul.bf16.gmra.mxu0 %v3045_v52  ;;  %v2313_v52 = vld [vmem:[#allocation8 + $0xe8] sm:$0xf0] }
  0xb0   :  { %771 = vmatmul.bf16.gmra.mxu1 %v3047_v55  ;;  %v2311_v55 = vld [vmem:[#allocation8 + $0xe0] sm:$0xf] }
  0xb1   :  { %800 = vmatmul.bf16.gmra.mxu2 %v3049_v58  ;;  %v2316_v58 = vor.u32 %v2689_v49, %v2313_v52  ;;  %v2281_v49 = vld [vmem:[#allocation8 + $0xa8] sm:$0xf0] }
  0xb2   :  { %829 = vmatmul.bf16.gmra.mxu3 %v3051_v59  ;;  %v2690_v59 = vld [vmem:[#allocation8 + $0xe4] sm:$0xf0] }
  0xb3   :  { %v2312_v60 = vor.u32 %v2690_v59, %v2311_v55  ;;  %1145 = vmatpush.bf16.msra.mxu3 %v2316_v58  ;;  %v2279_v55 = vld [vmem:[#allocation8 + $0xa0] sm:$0xf]  ;;  %v2682_v58 = vld [vmem:[#allocation8 + $0xa4] sm:$0xf0] }
  0xb5   :  { %1087 = vmatpush.bf16.msra.mxu1 %v2312_v60  ;;  %v2280_v60 = vor.u32 %v2682_v58, %v2279_v55 }
  0xb7   :  { %1146 = vmatpush.bf16.msra.mxu3 %v2308_v57  ;;  %v2276_v57 = vor.u32 %v2679_v2, %v2273_v54 }
  0xb9   :  { %1088 = vmatpush.bf16.msra.mxu1 %v2304_v3  ;;  %v2272_v3 = vor.u32 %v2680_v50, %v2271_v44 }
  0xbb   :  { %1147 = vmatpush.bf16.msra.mxu3 %v2300_v15 }
  0xbc   :  { %v612_v45 = vpop.f32.mrf.mxu0 }
  0xbd   :  { %v641_v46 = vpop.f32.mrf.mxu1  ;;  %v613_v47 = vadd.f32 %v612_v45, %v3072_v43  ;;  %1089 = vmatpush.bf16.msra.mxu1 %v2296_v19 }
  0xbf   :  { %v642_v62 = vadd.f32 %v641_v46, %v613_v47  ;;  %1148 = vmatpush.bf16.msra.mxu3 %v2292_v29  ;;  %v2681_v47 = vld [vmem:[#allocation8 + $0xa4] sm:$0xf] }
  0xc0   :  { %v2284_v52 = vor.u32 %v2681_v47, %v2281_v49 }
  0xc1   :  { %1090 = vmatpush.bf16.msra.mxu1 %v2288_v33 }
  0xc3   :  { %1149 = vmatpush.bf16.msra.mxu3 %v2284_v52 }
  0xc4   :  { %v670_v61 = vpop.f32.mrf.mxu2  ;;  %v614_v0 = vpop.f32.mrf.mxu0 }
  0xc5   :  { %v699_v63 = vpop.f32.mrf.mxu3  ;;  %v643_v48 = vpop.f32.mrf.mxu1  ;;  %v615_v1 = vadd.f32 %v614_v0, %v3072_v43  ;;  %v671_v53 = vadd.f32 %v670_v61, %v642_v62  ;;  %1091 = vmatpush.bf16.msra.mxu1 %v2280_v60 }
  0xc7   :  { %v644_v51 = vadd.f32 %v643_v48, %v615_v1  ;;  %v700_v4 = vadd.f32 %v699_v63, %v671_v53  ;;  %1150 = vmatpush.bf16.msra.mxu3 %v2276_v57 }
  0xc9   :  { %v835_v10 = vmax.f32 %v700_v4, 0.0  ;;  %1092 = vmatpush.bf16.msra.mxu1 %v2272_v3 }
  0xcc   :  { %v672_v56 = vpop.f32.mrf.mxu2  ;;  %v617_v7 = vpop.f32.mrf.mxu0 }
  0xcd   :  { %v673_v5 = vadd.f32 %v672_v56, %v644_v51  ;;  %v701_v6 = vpop.f32.mrf.mxu3  ;;  %v646_v8 = vpop.f32.mrf.mxu1  ;;  %v618_v12 = vadd.f32 %v617_v7, %v3072_v43 }
  0xcf   :  { %v702_v9 = vadd.f32 %v701_v6, %v673_v5  ;;  %v647_v21 = vadd.f32 %v646_v8, %v618_v12  ;;  %v2263_v12 = vld [vmem:[#allocation8 + $0x80] sm:$0xf] }
  0xd1   :  { %v837_v11 = vmax.f32 %v702_v9, 0.0 }
  0xd3   :  { %v851_v18 = vpack.c.bf16 %v837_v11, %v835_v10  ;;  %v2677_v10 = vld [vmem:[#allocation8 + $0x84] sm:$0xf]  ;;  %v2265_v11 = vld [vmem:[#allocation8 + $0x88] sm:$0xf0] }
  0xd4   :  { %v675_v20 = vpop.f32.mrf.mxu2  ;;  %v619_v23 = vpop.f32.mrf.mxu0  ;;  %v2268_v16 = vor.u32 %v2677_v10, %v2265_v11 }
  0xd5   :  { %v704_v22 = vpop.f32.mrf.mxu3  ;;  %1065 = vmatmul.bf16.vlgmr.msra.gmra.mxu0 %v851_v18  ;;  %1123 = vmatmul.bf16.vlgmr.msra.gmra.mxu2 %v851_v18  ;;  %v648_v24 = vpop.f32.mrf.mxu1  ;;  %v620_v25 = vadd.f32 %v619_v23, %v3072_v43  ;;  %v676_v26 = vadd.f32 %v675_v20, %v647_v21  ;;  %v2264_v18 = vor.u32 %v2678_v17, %v2263_v12 }
  0xd6   :  { %1151 = vmatpush.bf16.msra.mxu3 %v2268_v16 }
  0xd7   :  { %v649_v32 = vadd.f32 %v648_v24, %v620_v25  ;;  %v705_v35 = vadd.f32 %v704_v22, %v676_v26  ;;  %1093 = vmatpush.bf16.msra.mxu1 %v2264_v18 }
  0xd9   :  { %v839_v42 = vmax.f32 %v705_v35, 0.0 }
  0xdc   :  { %v677_v34 = vpop.f32.mrf.mxu2  ;;  %v622_v38 = vpop.f32.mrf.mxu0 }
  0xdd   :  { %v678_v36 = vadd.f32 %v677_v34, %v649_v32  ;;  %v706_v37 = vpop.f32.mrf.mxu3  ;;  %v651_v40 = vpop.f32.mrf.mxu1  ;;  %v623_v46 = vadd.f32 %v622_v38, %v3072_v43  ;;  %v3083_v32 = vperm.slane %v3069_v39, 1 }
  0xdf   :  { %v707_v41 = vadd.f32 %v706_v37, %v678_v36  ;;  %v652_v62 = vadd.f32 %v651_v40, %v623_v46 }
  0xe1   :  { %v841_v45 = vmax.f32 %v707_v41, 0.0 }
  0xe3   :  { %v853_v59 = vpack.c.bf16 %v841_v45, %v839_v42 }
  0xe4   :  { %v680_v61 = vpop.f32.mrf.mxu2  ;;  %v624_v0 = vpop.f32.mrf.mxu0 }
  0xe5   :  { %v709_v63 = vpop.f32.mrf.mxu3  ;;  %1070 = vmatmul.bf16.gmra.mxu0 %v853_v59  ;;  %1128 = vmatmul.bf16.gmra.mxu2 %v853_v59  ;;  %v653_v48 = vpop.f32.mrf.mxu1  ;;  %v625_v1 = vadd.f32 %v624_v0, %v3072_v43  ;;  %v681_v53 = vadd.f32 %v680_v61, %v652_v62 }
  0xe7   :  { %v654_v51 = vadd.f32 %v653_v48, %v625_v1  ;;  %v710_v4 = vadd.f32 %v709_v63, %v681_v53 }
  0xe9   :  { %v843_v13 = vmax.f32 %v710_v4, 0.0 }
  0xec   :  { %v682_v56 = vpop.f32.mrf.mxu2  ;;  %v627_v7 = vpop.f32.mrf.mxu0 }
  0xed   :  { %v683_v5 = vadd.f32 %v682_v56, %v654_v51  ;;  %v711_v6 = vpop.f32.mrf.mxu3  ;;  %v656_v8 = vpop.f32.mrf.mxu1  ;;  %v628_v15 = vadd.f32 %v627_v7, %v3072_v43 }
  0xef   :  { %v712_v9 = vadd.f32 %v711_v6, %v683_v5  ;;  %v657_v21 = vadd.f32 %v656_v8, %v628_v15 }
  0xf1   :  { %v845_v14 = vmax.f32 %v712_v9, 0.0 }
  0xf3   :  { %v855_v19 = vpack.c.bf16 %v845_v14, %v843_v13 }
  0xf4   :  { %v685_v20 = vpop.f32.mrf.mxu2  ;;  %v629_v23 = vpop.f32.mrf.mxu0 }
  0xf5   :  { %v714_v22 = vpop.f32.mrf.mxu3  ;;  %1075 = vmatmul.bf16.gmra.mxu0 %v855_v19  ;;  %1133 = vmatmul.bf16.gmra.mxu2 %v855_v19  ;;  %v658_v24 = vpop.f32.mrf.mxu1  ;;  %v630_v25 = vadd.f32 %v629_v23, %v3072_v43  ;;  %v686_v26 = vadd.f32 %v685_v20, %v657_v21 }
  0xf7   :  { %v659_v27 = vadd.f32 %v658_v24, %v630_v25  ;;  %v715_v29 = vadd.f32 %v714_v22, %v686_v26 }
  0xf9   :  { %v847_v36 = vmax.f32 %v715_v29, 0.0 }
  0xfc   :  { %v687_v28 = vpop.f32.mrf.mxu2  ;;  %v728_v33 = vpop.f32.mrf.mxu0 }
  0xfd   :  { %v688_v30 = vadd.f32 %v687_v28, %v659_v27  ;;  %v716_v31 = vpop.f32.mrf.mxu3  ;;  %v757_v34 = vpop.f32.mrf.mxu1  ;;  %v729_v38 = vadd.f32 %v728_v33, %v3083_v32 }
  0xff   :  { %v717_v35 = vadd.f32 %v716_v31, %v688_v30  ;;  %v758_v42 = vadd.f32 %v757_v34, %v729_v38 }
 0x101   :  { %v849_v37 = vmax.f32 %v717_v35, 0.0 }
 0x103   :  { %v857_v40 = vpack.c.bf16 %v849_v37, %v847_v36 }
 0x104   :  { %v786_v41 = vpop.f32.mrf.mxu2  ;;  %v730_v45 = vpop.f32.mrf.mxu0 }
 0x105   :  { %v815_v43 = vpop.f32.mrf.mxu3  ;;  %1080 = vmatmul.bf16.gmra.mxu0 %v857_v40  ;;  %1138 = vmatmul.bf16.gmra.mxu2 %v857_v40  ;;  %v759_v46 = vpop.f32.mrf.mxu1  ;;  %v731_v47 = vadd.f32 %v730_v45, %v3083_v32  ;;  %v787_v49 = vadd.f32 %v786_v41, %v758_v42 }
 0x107   :  { %v760_v39 = vadd.f32 %v759_v46, %v731_v47  ;;  %v816_v55 = vadd.f32 %v815_v43, %v787_v49 }
 0x109   :  { %v836_v63 = vmax.f32 %v816_v55, 0.0 }
 0x10c   :  { %v788_v52 = vpop.f32.mrf.mxu2  ;;  %v733_v60 = vpop.f32.mrf.mxu0 }
 0x10d   :  { %v789_v58 = vadd.f32 %v788_v52, %v760_v39  ;;  %v817_v59 = vpop.f32.mrf.mxu3  ;;  %v762_v61 = vpop.f32.mrf.mxu1  ;;  %v734_v48 = vadd.f32 %v733_v60, %v3083_v32  ;;  %v2753_v60 = vld [vmem:[#allocation11 + $0x1e4] sm:$0xf] }
 0x10f   :  { %v818_v62 = vadd.f32 %v817_v59, %v789_v58  ;;  %v763_v2 = vadd.f32 %v762_v61, %v734_v48  ;;  %v2721_v58 = vld [vmem:[#allocation11 + $0xe4] sm:$0xf]  ;;  %v2441_v59 = vld [vmem:[#allocation11 + $0xf0] sm:$0xf0]  ;;  %v2567_v48 = vld [vmem:[#allocation11 + $0x1e0] sm:$0xf] }
 0x110   :  { %v2444_v61 = vor.u32 %v2721_v58, %v2441_v59  ;;  %v2489_v58 = vld [vmem:[#allocation11 + $0x150] sm:$0xf0] }
 0x111   :  { %v838_v0 = vmax.f32 %v818_v62, 0.0  ;;  %v2569_v62 = vld [vmem:[#allocation11 + $0x1f0] sm:$0xf0] }
 0x112   :  { %1649 = vmatpush.bf16.msrb.mxu2 %v2444_v61  ;;  %v2703_v61 = vld [vmem:[#allocation11 + $0x4c] sm:$0xf0] }
 0x113   :  { %v852_v1 = vpack.c.bf16 %v838_v0, %v836_v63  ;;  %v2572_v63 = vor.u32 %v2753_v60, %v2569_v62  ;;  %v2723_v0 = vld [vmem:[#allocation11 + $0xec] sm:$0xf0]  ;;  %v2359_v60 = vld [vmem:[#allocation11 + $0x40] sm:$0xf] }
 0x114   :  { %v791_v53 = vpop.f32.mrf.mxu2  ;;  %v735_v57 = vpop.f32.mrf.mxu0  ;;  %v2360_v62 = vor.u32 %v2703_v61, %v2359_v60  ;;  %v2417_v60 = vld [vmem:[#allocation11 + $0xb8] sm:$0xf0]  ;;  %v2746_v61 = vld [vmem:[#allocation11 + $0x1ac] sm:$0xf] }
 0x115   :  { %v820_v54 = vpop.f32.mrf.mxu3  ;;  %1094 = vmatmul.bf16.vlgmr.msra.gmra.mxu1 %v852_v1  ;;  %1152 = vmatmul.bf16.vlgmr.msra.gmra.mxu3 %v852_v1  ;;  %v764_v44 = vpop.f32.mrf.mxu1  ;;  %v736_v50 = vadd.f32 %v735_v57, %v3083_v32  ;;  %v792_v51 = vadd.f32 %v791_v53, %v763_v2  ;;  %v2755_v53 = vld [vmem:[#allocation11 + $0x1ec] sm:$0xf0]  ;;  %v2717_v2 = vld [vmem:[#allocation11 + $0xc4] sm:$0xf] }
 0x116   :  { %1678 = vmatpush.bf16.msrb.mxu3 %v2572_v63  ;;  %v2568_v57 = vor.u32 %v2755_v53, %v2567_v48  ;;  %v2487_v63 = vld [vmem:[#allocation11 + $0x140] sm:$0xf]  ;;  %v2729_v53 = vld [vmem:[#allocation11 + $0x124] sm:$0xf] }
 0x117   :  { %v765_v3 = vadd.f32 %v764_v44, %v736_v50  ;;  %v821_v4 = vadd.f32 %v820_v54, %v792_v51  ;;  %v2425_v54 = vld [vmem:[#allocation11 + $0xd0] sm:$0xf0]  ;;  %v2749_v50 = vld [vmem:[#allocation11 + $0x1c4] sm:$0xf] }
 0x118   :  { %v2428_v44 = vor.u32 %v2717_v2, %v2425_v54  ;;  %v2553_v51 = vld [vmem:[#allocation11 + $0x1d0] sm:$0xf0]  ;;  %1620 = vmatpush.bf16.msrb.mxu1 %v2568_v57 }
 0x119   :  { %v840_v10 = vmax.f32 %v821_v4, 0.0  ;;  %v2719_v4 = vld [vmem:[#allocation11 + $0xcc] sm:$0xf0]  ;;  %v2473_v2 = vld [vmem:[#allocation11 + $0x130] sm:$0xf0] }
 0x11a   :  { %1650 = vmatpush.bf16.msrb.mxu2 %v2428_v44  ;;  %v2476_v57 = vor.u32 %v2729_v53, %v2473_v2  ;;  %v2343_v44 = vld [vmem:[#allocation11 + $0x20] sm:$0xf] }
 0x11c   :  { %v793_v56 = vpop.f32.mrf.mxu2  ;;  %v738_v7 = vpop.f32.mrf.mxu0 }
 0x11d   :  { %v794_v5 = vadd.f32 %v793_v56, %v765_v3  ;;  %v822_v6 = vpop.f32.mrf.mxu3  ;;  %v767_v8 = vpop.f32.mrf.mxu1  ;;  %v739_v12 = vadd.f32 %v738_v7, %v3083_v32  ;;  %v2556_v3 = vor.u32 %v2749_v50, %v2553_v51  ;;  %v2423_v56 = vld [vmem:[#allocation11 + $0xc0] sm:$0xf]  ;;  %v2751_v7 = vld [vmem:[#allocation11 + $0x1cc] sm:$0xf0] }
 0x11e   :  { %v2699_v50 = vld [vmem:[#allocation11 + $0x2c] sm:$0xf0] }
 0x11f   :  { %v823_v9 = vadd.f32 %v822_v6, %v794_v5  ;;  %v768_v15 = vadd.f32 %v767_v8, %v739_v12  ;;  %1679 = vmatpush.bf16.msrb.mxu3 %v2556_v3  ;;  %v2551_v5 = vld [vmem:[#allocation11 + $0x1c0] sm:$0xf]  ;;  %v2424_v6 = vor.u32 %v2719_v4, %v2423_v56  ;;  %v2713_v8 = vld [vmem:[#allocation11 + $0xa4] sm:$0xf]  ;;  %v2344_v51 = vor.u32 %v2699_v50, %v2343_v44  ;;  %v2329_v56 = vld [vmem:[#allocation11 + $0x10] sm:$0xf0] }
 0x120   :  { %v2745_v12 = vld [vmem:[#allocation11 + $0x1a4] sm:$0xf]  ;;  %v2327_v4 = vld [vmem:[#allocation11] sm:$0xf] }
 0x121   :  { %v842_v11 = vmax.f32 %v823_v9, 0.0  ;;  %v2409_v9 = vld [vmem:[#allocation11 + $0xb0] sm:$0xf0]  ;;  %v2693_v3 = vld [vmem:[#allocation11 + $0x4] sm:$0xf] }
 0x123   :  { %v854_v13 = vpack.c.bf16 %v842_v11, %v840_v10  ;;  %v2552_v10 = vor.u32 %v2751_v7, %v2551_v5  ;;  %v2412_v11 = vor.u32 %v2713_v8, %v2409_v9  ;;  %v2332_v5 = vor.u32 %v2693_v3, %v2329_v56  ;;  %v2471_v7 = vld [vmem:[#allocation11 + $0x120] sm:$0xf]  ;;  %v2731_v8 = vld [vmem:[#allocation11 + $0x12c] sm:$0xf0] }
 0x124   :  { %v796_v14 = vpop.f32.mrf.mxu2  ;;  %v740_v17 = vpop.f32.mrf.mxu0 }
 0x125   :  { %v825_v16 = vpop.f32.mrf.mxu3  ;;  %1099 = vmatmul.bf16.gmra.mxu1 %v854_v13  ;;  %1157 = vmatmul.bf16.gmra.mxu3 %v854_v13  ;;  %v769_v18 = vpop.f32.mrf.mxu1  ;;  %v741_v19 = vadd.f32 %v740_v17, %v3083_v32  ;;  %v797_v20 = vadd.f32 %v796_v14, %v768_v15  ;;  %v2537_v13 = vld [vmem:[#allocation11 + $0x1b0] sm:$0xf0]  ;;  %v2407_v15 = vld [vmem:[#allocation11 + $0xa0] sm:$0xf] }
 0x126   :  { %v2540_v14 = vor.u32 %v2745_v12, %v2537_v13  ;;  %1621 = vmatpush.bf16.msrb.mxu1 %v2552_v10  ;;  %1651 = vmatpush.bf16.msrb.mxu2 %v2412_v11  ;;  %v2535_v17 = vld [vmem:[#allocation11 + $0x1a0] sm:$0xf]  ;;  %v2472_v10 = vor.u32 %v2731_v8, %v2471_v7  ;;  %v2725_v11 = vld [vmem:[#allocation11 + $0x104] sm:$0xf]  ;;  %v2457_v12 = vld [vmem:[#allocation11 + $0x110] sm:$0xf0] }
 0x127   :  { %v770_v21 = vadd.f32 %v769_v18, %v741_v19  ;;  %v826_v23 = vadd.f32 %v825_v16, %v797_v20  ;;  %v2715_v16 = vld [vmem:[#allocation11 + $0xac] sm:$0xf0]  ;;  %v2709_v20 = vld [vmem:[#allocation11 + $0x84] sm:$0xf]  ;;  %v2716_v7 = vld [vmem:[#allocation11 + $0xb4] sm:$0xf0] }
 0x128   :  { %1680 = vmatpush.bf16.msrb.mxu3 %v2540_v14  ;;  %v2408_v18 = vor.u32 %v2715_v16, %v2407_v15  ;;  %v2747_v19 = vld [vmem:[#allocation11 + $0x1ac] sm:$0xf0]  ;;  %v2460_v14 = vor.u32 %v2725_v11, %v2457_v12  ;;  %v2455_v15 = vld [vmem:[#allocation11 + $0x100] sm:$0xf]  ;;  %v2543_v8 = vld [vmem:[#allocation11 + $0x1a8] sm:$0xf] }
 0x129   :  { %v844_v29 = vmax.f32 %v826_v23, 0.0  ;;  %v2727_v16 = vld [vmem:[#allocation11 + $0x10c] sm:$0xf0]  ;;  %v2748_v11 = vld [vmem:[#allocation11 + $0x1b4] sm:$0xf0] }
 0x12a   :  { %v2710_v12 = vld [vmem:[#allocation11 + $0x8c] sm:$0xf] }
 0x12c   :  { %v798_v22 = vpop.f32.mrf.mxu2  ;;  %v743_v26 = vpop.f32.mrf.mxu0 }
 0x12d   :  { %v799_v24 = vadd.f32 %v798_v22, %v770_v21  ;;  %v827_v25 = vpop.f32.mrf.mxu3  ;;  %v772_v28 = vpop.f32.mrf.mxu1  ;;  %v744_v31 = vadd.f32 %v743_v26, %v3083_v32  ;;  %v2393_v21 = vld [vmem:[#allocation11 + $0x90] sm:$0xf0]  ;;  %v2536_v22 = vor.u32 %v2747_v19, %v2535_v17  ;;  %v2456_v17 = vor.u32 %v2727_v16, %v2455_v15  ;;  %v2449_v19 = vld [vmem:[#allocation11 + $0xf8] sm:$0xf0] }
 0x12e   :  { %v2396_v23 = vor.u32 %v2709_v20, %v2393_v21  ;;  %v2544_v15 = vor.u32 %v2748_v11, %v2543_v8  ;;  %v2367_v8 = vld [vmem:[#allocation11 + $0x48] sm:$0xf] }
 0x12f   :  { %v828_v27 = vadd.f32 %v827_v25, %v799_v24  ;;  %v773_v35 = vadd.f32 %v772_v28, %v744_v31  ;;  %v2741_v24 = vld [vmem:[#allocation11 + $0x184] sm:$0xf]  ;;  %v2521_v25 = vld [vmem:[#allocation11 + $0x190] sm:$0xf0]  ;;  %1622 = vmatpush.bf16.msrb.mxu1 %v2536_v22  ;;  %v2711_v28 = vld [vmem:[#allocation11 + $0x8c] sm:$0xf0] }
 0x130   :  { %v2524_v26 = vor.u32 %v2741_v24, %v2521_v25  ;;  %1652 = vmatpush.bf16.msrb.mxu2 %v2396_v23  ;;  %v2743_v31 = vld [vmem:[#allocation11 + $0x18c] sm:$0xf0]  ;;  %v2754_v22 = vld [vmem:[#allocation11 + $0x1ec] sm:$0xf]  ;;  %v2577_v23 = vld [vmem:[#allocation11 + $0x1f8] sm:$0xf0] }
 0x131   :  { %v846_v30 = vmax.f32 %v828_v27, 0.0  ;;  %v2391_v27 = vld [vmem:[#allocation11 + $0x80] sm:$0xf]  ;;  %v2580_v24 = vor.u32 %v2754_v22, %v2577_v23 }
 0x132   :  { %1681 = vmatpush.bf16.msrb.mxu3 %v2524_v26  ;;  %v891_v26 = vld [vmem:[#allocation10] sm:$0x3] }
 0x133   :  { %v856_v33 = vpack.c.bf16 %v846_v30, %v844_v29  ;;  %v2519_v29 = vld [vmem:[#allocation11 + $0x180] sm:$0xf]  ;;  %v2392_v30 = vor.u32 %v2711_v28, %v2391_v27  ;;  %v2447_v27 = vld [vmem:[#allocation11 + $0xe8] sm:$0xf]  ;;  %v2724_v28 = vld [vmem:[#allocation11 + $0xf4] sm:$0xf0] }
 0x134   :  { %v801_v34 = vpop.f32.mrf.mxu2  ;;  %v745_v37 = vpop.f32.mrf.mxu0 }
 0x135   :  { %v830_v36 = vpop.f32.mrf.mxu3  ;;  %1104 = vmatmul.bf16.gmra.mxu1 %v856_v33  ;;  %1162 = vmatmul.bf16.gmra.mxu3 %v856_v33  ;;  %v746_v38 = vadd.f32 %v745_v37, %v3083_v32  ;;  %v802_v40 = vadd.f32 %v801_v34, %v773_v35  ;;  %v774_v41 = vpop.f32.mrf.mxu1  ;;  %v2439_v32 = vld [vmem:[#allocation11 + $0xe0] sm:$0xf]  ;;  %v2705_v33 = vld [vmem:[#allocation11 + $0x64] sm:$0xf]  ;;  %v2377_v34 = vld [vmem:[#allocation11 + $0x70] sm:$0xf0]  ;;  %v2520_v35 = vor.u32 %v2743_v31, %v2519_v29 }
 0x136   :  { %v2440_v1 = vor.u32 %v2723_v0, %v2439_v32  ;;  %v2737_v37 = vld [vmem:[#allocation11 + $0x164] sm:$0xf]  ;;  %v2735_v32 = vld [vmem:[#allocation11 + $0x14c] sm:$0xf0]  ;;  %v2575_v29 = vld [vmem:[#allocation11 + $0x1e8] sm:$0xf]  ;;  %v2448_v31 = vor.u32 %v2724_v28, %v2447_v27 }
 0x137   :  { %v775_v42 = vadd.f32 %v774_v41, %v746_v38  ;;  %v831_v45 = vadd.f32 %v830_v36, %v802_v40  ;;  %v2380_v36 = vor.u32 %v2705_v33, %v2377_v34  ;;  %v2505_v38 = vld [vmem:[#allocation11 + $0x170] sm:$0xf0]  ;;  %1623 = vmatpush.bf16.msrb.mxu1 %v2520_v35  ;;  %v2375_v41 = vld [vmem:[#allocation11 + $0x60] sm:$0xf]  ;;  %v2697_v0 = vld [vmem:[#allocation11 + $0x24] sm:$0xf]  ;;  %v2488_v48 = vor.u32 %v2735_v32, %v2487_v63 }
 0x138   :  { %1591 = vmatpush.bf16.msrb.mxu0 %v2440_v1  ;;  %v2508_v40 = vor.u32 %v2737_v37, %v2505_v38  ;;  %v2345_v1 = vld [vmem:[#allocation11 + $0x30] sm:$0xf0]  ;;  %v2756_v33 = vld [vmem:[#allocation11 + $0x1f4] sm:$0xf0]  ;;  %v2718_v34 = vld [vmem:[#allocation11 + $0xcc] sm:$0xf] }
 0x139   :  { %v848_v39 = vmax.f32 %v831_v45, 0.0  ;;  %1653 = vmatpush.bf16.msrb.mxu2 %v2380_v36  ;;  %v2348_v54 = vor.u32 %v2697_v0, %v2345_v1  ;;  %v2433_v35 = vld [vmem:[#allocation11 + $0xd8] sm:$0xf0]  ;;  %v2576_v36 = vor.u32 %v2756_v33, %v2575_v29  ;;  %v2750_v38 = vld [vmem:[#allocation11 + $0x1cc] sm:$0xf] }
 0x13a   :  { %1682 = vmatpush.bf16.msrb.mxu3 %v2508_v40  ;;  %v2436_v37 = vor.u32 %v2718_v34, %v2433_v35  ;;  %v2561_v40 = vld [vmem:[#allocation11 + $0x1d8] sm:$0xf0]  ;;  %v2527_v28 = vld [vmem:[#allocation11 + $0x188] sm:$0xf]  ;;  %v2744_v29 = vld [vmem:[#allocation11 + $0x194] sm:$0xf0] }
 0x13b   :  { %v2528_v33 = vor.u32 %v2744_v29, %v2527_v28  ;;  %v2385_v34 = vld [vmem:[#allocation11 + $0x78] sm:$0xf0]  ;;  %v2738_v35 = vld [vmem:[#allocation11 + $0x16c] sm:$0xf]  ;;  %v2732_v28 = vld [vmem:[#allocation11 + $0x134] sm:$0xf0] }
 0x13c   :  { %v803_v43 = vpop.f32.mrf.mxu2  ;;  %1592 = vmatpush.bf16.msrb.mxu0 %v2424_v6  ;;  %v2695_v6 = vld [vmem:[#allocation11 + $0xc] sm:$0xf0] }
 0x13d   :  { %v804_v46 = vadd.f32 %v803_v43, %v775_v42  ;;  %v832_v47 = vpop.f32.mrf.mxu3  ;;  %v2707_v42 = vld [vmem:[#allocation11 + $0x6c] sm:$0xf0]  ;;  %v2503_v43 = vld [vmem:[#allocation11 + $0x160] sm:$0xf]  ;;  %v2328_v9 = vor.u32 %v2695_v6, %v2327_v4  ;;  %v2415_v6 = vld [vmem:[#allocation11 + $0xa8] sm:$0xf] }
 0x13e   :  { %v2376_v45 = vor.u32 %v2707_v42, %v2375_v41  ;;  %v2564_v42 = vor.u32 %v2750_v38, %v2561_v40 }
 0x13f   :  { %v833_v49 = vadd.f32 %v832_v47, %v804_v46  ;;  %v2739_v46 = vld [vmem:[#allocation11 + $0x16c] sm:$0xf0]  ;;  %v2701_v47 = vld [vmem:[#allocation11 + $0x44] sm:$0xf] }
 0x140   :  { %1593 = vmatpush.bf16.msrb.mxu0 %v2408_v18  ;;  %v2722_v18 = vld [vmem:[#allocation11 + $0xec] sm:$0xf] }
 0x141   :  { %v850_v52 = vmax.f32 %v833_v49, 0.0  ;;  %v2361_v49 = vld [vmem:[#allocation11 + $0x50] sm:$0xf0]  ;;  %v2452_v21 = vor.u32 %v2722_v18, %v2449_v19  ;;  %v2529_v18 = vld [vmem:[#allocation11 + $0x198] sm:$0xf0] }
 0x143   :  { %v858_v55 = vpack.c.bf16 %v850_v52, %v848_v39  ;;  %v2504_v39 = vor.u32 %v2739_v46, %v2503_v43  ;;  %v2364_v52 = vor.u32 %v2701_v47, %v2361_v49  ;;  %v3093_v43 = vperm.slane %v891_v26, 0  ;;  %v2431_v46 = vld [vmem:[#allocation11 + $0xc8] sm:$0xf]  ;;  %v2720_v47 = vld [vmem:[#allocation11 + $0xd4] sm:$0xf0] }
 0x144   :  { %1594 = vmatpush.bf16.msrb.mxu0 %v2392_v30  ;;  %v2432_v49 = vor.u32 %v2720_v47, %v2431_v46 }
 0x145   :  { %1109 = vmatmul.bf16.gmra.mxu1 %v858_v55  ;;  %1167 = vmatmul.bf16.gmra.mxu3 %v858_v55  ;;  %v2733_v55 = vld [vmem:[#allocation11 + $0x144] sm:$0xf] }
 0x146   :  { %v2492_v59 = vor.u32 %v2733_v55, %v2489_v58  ;;  %1624 = vmatpush.bf16.msrb.mxu1 %v2504_v39  ;;  %1654 = vmatpush.bf16.msrb.mxu2 %v2364_v52  ;;  %v2559_v39 = vld [vmem:[#allocation11 + $0x1c8] sm:$0xf]  ;;  %v2752_v52 = vld [vmem:[#allocation11 + $0x1d4] sm:$0xf0]  ;;  %v2714_v55 = vld [vmem:[#allocation11 + $0xac] sm:$0xf] }
 0x147   :  { %v2420_v32 = vor.u32 %v2714_v55, %v2417_v60 }
 0x148   :  { %1595 = vmatpush.bf16.msrb.mxu0 %v2376_v45  ;;  %1683 = vmatpush.bf16.msrb.mxu3 %v2492_v59  ;;  %v2560_v59 = vor.u32 %v2752_v52, %v2559_v39 }
 0x14a   :  { %1625 = vmatpush.bf16.msrb.mxu1 %v2488_v48  ;;  %1655 = vmatpush.bf16.msrb.mxu2 %v2348_v54  ;;  %v3098_v48 = vperm.slane %v891_v26, 1  ;;  %v2712_v26 = vld [vmem:[#allocation11 + $0x94] sm:$0xf0] }
 0x14c   :  { %1596 = vmatpush.bf16.msrb.mxu0 %v2360_v62  ;;  %1684 = vmatpush.bf16.msrb.mxu3 %v2476_v57  ;;  %v2545_v62 = vld [vmem:[#allocation11 + $0x1b8] sm:$0xf0] }
 0x14d   :  { %v2548_v0 = vor.u32 %v2746_v61, %v2545_v62  ;;  %v2383_v61 = vld [vmem:[#allocation11 + $0x68] sm:$0xf]  ;;  %v2708_v62 = vld [vmem:[#allocation11 + $0x74] sm:$0xf0] }
 0x14e   :  { %1656 = vmatpush.bf16.msrb.mxu2 %v2332_v5  ;;  %1626 = vmatpush.bf16.msrb.mxu1 %v2472_v10  ;;  %v2416_v10 = vor.u32 %v2716_v7, %v2415_v6 }
 0x150   :  { %1597 = vmatpush.bf16.msrb.mxu0 %v2344_v51  ;;  %1685 = vmatpush.bf16.msrb.mxu3 %v2460_v14 }
 0x152   :  { %v1066_v13 = vpop.f32.mrf.mxu0  ;;  %1627 = vmatpush.bf16.msrb.mxu1 %v2456_v17  ;;  %1765 = vmatpush.bf16.msra.mxu2 %v2452_v21  ;;  %v2742_v17 = vld [vmem:[#allocation11 + $0x18c] sm:$0xf] }
 0x153   :  { %v1067_v58 = vadd.f32 %v1066_v13, %v3093_v43  ;;  %v2401_v13 = vld [vmem:[#allocation11 + $0x98] sm:$0xf0] }
 0x154   :  { %1598 = vmatpush.bf16.msrb.mxu0 %v2328_v9  ;;  %1794 = vmatpush.bf16.msra.mxu3 %v2580_v24  ;;  %v2404_v16 = vor.u32 %v2710_v12, %v2401_v13  ;;  %v2495_v12 = vld [vmem:[#allocation11 + $0x148] sm:$0xf]  ;;  %v2736_v13 = vld [vmem:[#allocation11 + $0x154] sm:$0xf0] }
 0x156   :  { %1736 = vmatpush.bf16.msra.mxu1 %v2576_v36  ;;  %1766 = vmatpush.bf16.msra.mxu2 %v2436_v37  ;;  %v2513_v36 = vld [vmem:[#allocation11 + $0x178] sm:$0xf0] }
 0x158   :  { %v1124_v20 = vpop.f32.mrf.mxu2  ;;  %1707 = vmatpush.bf16.msra.mxu0 %v2448_v31  ;;  %1795 = vmatpush.bf16.msra.mxu3 %v2564_v42 }
 0x159   :  { %v1125_v44 = vadd.f32 %v1124_v20, %v3098_v48  ;;  %v2532_v20 = vor.u32 %v2742_v17, %v2529_v18 }
 0x15a   :  { %v1068_v25 = vpop.f32.mrf.mxu0  ;;  %1737 = vmatpush.bf16.msra.mxu1 %v2560_v59  ;;  %1767 = vmatpush.bf16.msra.mxu2 %v2420_v32 }
 0x15b   :  { %v1069_v1 = vadd.f32 %v1068_v25, %v3093_v43  ;;  %v2399_v25 = vld [vmem:[#allocation11 + $0x88] sm:$0xf] }
 0x15c   :  { %1708 = vmatpush.bf16.msra.mxu0 %v2432_v49  ;;  %1796 = vmatpush.bf16.msra.mxu3 %v2548_v0  ;;  %v2400_v27 = vor.u32 %v2712_v26, %v2399_v25  ;;  %v2384_v0 = vor.u32 %v2708_v62, %v2383_v61  ;;  %v2700_v26 = vld [vmem:[#allocation11 + $0x34] sm:$0xf0] }
 0x15e   :  { %1738 = vmatpush.bf16.msra.mxu1 %v2544_v15  ;;  %1768 = vmatpush.bf16.msra.mxu2 %v2404_v16  ;;  %v2698_v15 = vld [vmem:[#allocation11 + $0x2c] sm:$0xf]  ;;  %v2353_v16 = vld [vmem:[#allocation11 + $0x38] sm:$0xf0] }
 0x15f   :  { %v2356_v18 = vor.u32 %v2698_v15, %v2353_v16 }
 0x160   :  { %v1126_v30 = vpop.f32.mrf.mxu2  ;;  %1709 = vmatpush.bf16.msra.mxu0 %v2416_v10  ;;  %1797 = vmatpush.bf16.msra.mxu3 %v2532_v20  ;;  %v2481_v20 = vld [vmem:[#allocation11 + $0x138] sm:$0xf0] }
 0x161   :  { %v1127_v56 = vadd.f32 %v1126_v30, %v3098_v48  ;;  %v2706_v30 = vld [vmem:[#allocation11 + $0x6c] sm:$0xf] }
 0x162   :  { %v3095_v45 = vpop.f32.mrf.mxu0  ;;  %v2388_v40 = vor.u32 %v2706_v30, %v2385_v34  ;;  %1739 = vmatpush.bf16.msra.mxu1 %v2528_v33  ;;  %v2694_v34 = vld [vmem:[#allocation11 + $0xc] sm:$0xf] }
 0x163   :  { %v1072_v31 = vadd.f32 %v3095_v45, %v3093_v43 }
 0x164   :  { %1710 = vmatpush.bf16.msra.mxu0 %v2400_v27  ;;  %1769 = vmatpush.bf16.msra.mxu2 %v2388_v40  ;;  %v2479_v27 = vld [vmem:[#allocation11 + $0x128] sm:$0xf]  ;;  %v2696_v40 = vld [vmem:[#allocation11 + $0x14] sm:$0xf0] }
 0x165   :  { %v2480_v33 = vor.u32 %v2732_v28, %v2479_v27 }
 0x168   :  { %v1129_v2 = vpop.f32.mrf.mxu2  ;;  %1711 = vmatpush.bf16.msra.mxu0 %v2384_v0  ;;  %v2463_v0 = vld [vmem:[#allocation11 + $0x108] sm:$0xf] }
 0x169   :  { %v1130_v49 = vadd.f32 %v1129_v2, %v3098_v48 }
 0x16a   :  { %v1073_v3 = vpop.f32.mrf.mxu0 }
 0x16b   :  { %v1074_v42 = vadd.f32 %v1073_v3, %v3093_v43 }
 0x170   :  { %v1131_v23 = vpop.f32.mrf.mxu2 }
 0x172   :  { %v1076_v37 = vpop.f32.mrf.mxu0 }
 0x173   :  { %v1077_v17 = vadd.f32 %v1076_v37, %v3093_v43 }
 0x178   :  { %v3115_v55 = vpop.f32.mrf.mxu2 }
 0x17a   :  { %v1078_v3 = vpop.f32.mrf.mxu0 }
 0x17b   :  { %v1079_v29 = vadd.f32 %v1078_v3, %v3093_v43 }
 0x192   :  { %v1095_v41 = vpop.f32.mrf.mxu1 }
 0x193   :  { %v1096_v53 = vadd.f32 %v1095_v41, %v1067_v58  ;;  %v2516_v41 = vor.u32 %v2738_v35, %v2513_v36  ;;  %v1132_v58 = vadd.f32 %v1131_v23, %v3098_v48  ;;  %v2337_v35 = vld [vmem:[#allocation11 + $0x18] sm:$0xf0]  ;;  %v2335_v36 = vld [vmem:[#allocation11 + $0x8] sm:$0xf] }
 0x195   :  { %v1173_v50 = vmax.f32 %v1096_v53, 0.0  ;;  %1798 = vmatpush.bf16.msra.mxu3 %v2516_v41  ;;  %v2702_v53 = vld [vmem:[#allocation11 + $0x4c] sm:$0xf] }
 0x196   :  { %v2726_v41 = vld [vmem:[#allocation11 + $0x10c] sm:$0xf] }
 0x198   :  { %v1153_v63 = vpop.f32.mrf.mxu3 }
 0x199   :  { %v1154_v4 = vadd.f32 %v1153_v63, %v1125_v44  ;;  %v2511_v63 = vld [vmem:[#allocation11 + $0x168] sm:$0xf] }
 0x19a   :  { %v1097_v54 = vpop.f32.mrf.mxu1 }
 0x19b   :  { %v1098_v57 = vadd.f32 %v1097_v54, %v1069_v1  ;;  %v1174_v21 = vmax.f32 %v1154_v4, 0.0  ;;  %v2740_v1 = vld [vmem:[#allocation11 + $0x174] sm:$0xf0]  ;;  %v2369_v54 = vld [vmem:[#allocation11 + $0x58] sm:$0xf0] }
 0x19c   :  { %v2512_v2 = vor.u32 %v2740_v1, %v2511_v63  ;;  %v2372_v44 = vor.u32 %v2702_v53, %v2369_v54  ;;  %v2728_v1 = vld [vmem:[#allocation11 + $0x114] sm:$0xf0] }
 0x19d   :  { %v1175_v51 = vmax.f32 %v1098_v57, 0.0 }
 0x19e   :  { %1740 = vmatpush.bf16.msra.mxu1 %v2512_v2  ;;  %1770 = vmatpush.bf16.msra.mxu2 %v2372_v44 }
 0x19f   :  { %v3103_v5 = vpack.c.bf16 %v1175_v51, %v1173_v50  ;;  %v2734_v50 = vld [vmem:[#allocation11 + $0x14c] sm:$0xf]  ;;  %v2497_v51 = vld [vmem:[#allocation11 + $0x158] sm:$0xf0] }
 0x1a0   :  { %v1155_v9 = vpop.f32.mrf.mxu3  ;;  %v2500_v4 = vor.u32 %v2734_v50, %v2497_v51 }
 0x1a1   :  { %v1156_v14 = vadd.f32 %v1155_v9, %v1127_v56  ;;  %1599 = vmatmul.bf16.vlgmr.msrb.gmra.mxu0 %v3103_v5  ;;  %1657 = vmatmul.bf16.vlgmr.msrb.gmra.mxu2 %v3103_v5  ;;  %v2704_v9 = vld [vmem:[#allocation11 + $0x54] sm:$0xf0] }
 0x1a2   :  { %v1100_v19 = vpop.f32.mrf.mxu1  ;;  %1799 = vmatpush.bf16.msra.mxu3 %v2500_v4  ;;  %v2368_v11 = vor.u32 %v2704_v9, %v2367_v8  ;;  %1771 = vmatpush.bf16.msra.mxu2 %v2356_v18 }
 0x1a3   :  { %v1176_v22 = vmax.f32 %v1156_v14, 0.0  ;;  %v1101_v46 = vadd.f32 %v1100_v19, %v1072_v31  ;;  %v2496_v14 = vor.u32 %v2736_v13, %v2495_v12  ;;  %v2730_v19 = vld [vmem:[#allocation11 + $0x12c] sm:$0xf] }
 0x1a4   :  { %1712 = vmatpush.bf16.msra.mxu0 %v2368_v11  ;;  %v2484_v25 = vor.u32 %v2730_v19, %v2481_v20 }
 0x1a5   :  { %v3107_v24 = vpack.c.bf16 %v1176_v22, %v1174_v21  ;;  %v1177_v39 = vmax.f32 %v1101_v46, 0.0  ;;  %v2351_v21 = vld [vmem:[#allocation11 + $0x28] sm:$0xf]  ;;  %v1136_v22 = vpop.f32.mrf.mxu2  ;;  %1741 = vmatpush.bf16.msra.mxu1 %v2496_v14 }
 0x1a6   :  { %v2352_v31 = vor.u32 %v2700_v26, %v2351_v21  ;;  %1800 = vmatpush.bf16.msra.mxu3 %v2484_v25 }
 0x1a7   :  { %1628 = vmatmul.bf16.vlgmr.msrb.gmra.mxu1 %v3107_v24  ;;  %1686 = vmatmul.bf16.vlgmr.msrb.gmra.mxu3 %v3107_v24 }
 0x1a8   :  { %v1158_v38 = vpop.f32.mrf.mxu3  ;;  %1713 = vmatpush.bf16.msra.mxu0 %v2352_v31 }
 0x1a9   :  { %v1159_v59 = vadd.f32 %v1158_v38, %v1130_v49  ;;  %v2340_v38 = vor.u32 %v2694_v34, %v2337_v35  ;;  %1742 = vmatpush.bf16.msra.mxu1 %v2480_v33  ;;  %v2336_v49 = vor.u32 %v2696_v40, %v2335_v36 }
 0x1aa   :  { %v1102_v47 = vpop.f32.mrf.mxu1 }
 0x1ab   :  { %v1103_v45 = vadd.f32 %v1102_v47, %v1074_v42  ;;  %v1178_v6 = vmax.f32 %v1159_v59, 0.0  ;;  %v2465_v42 = vld [vmem:[#allocation11 + $0x118] sm:$0xf0]  ;;  %1772 = vmatpush.bf16.msra.mxu2 %v2340_v38  ;;  %v1137_v59 = vadd.f32 %v1136_v22, %v3098_v48 }
 0x1ac   :  { %v2468_v47 = vor.u32 %v2726_v41, %v2465_v42  ;;  %1714 = vmatpush.bf16.msra.mxu0 %v2336_v49 }
 0x1ad   :  { %v1179_v52 = vmax.f32 %v1103_v45, 0.0  ;;  %v1081_v45 = vpop.f32.mrf.mxu0  ;;  %v1139_v53 = vpop.f32.mrf.mxu2 }
 0x1ae   :  { %1801 = vmatpush.bf16.msra.mxu3 %v2468_v47  ;;  %v1082_v51 = vadd.f32 %v1081_v45, %v3093_v43  ;;  %v1140_v9 = vadd.f32 %v1139_v53, %v3098_v48 }
 0x1af   :  { %v3118_v60 = vpack.c.bf16 %v1179_v52, %v1177_v39  ;;  %v1135_v39 = vadd.f32 %v3115_v55, %v3098_v48 }
 0x1b0   :  { %v1160_v32 = vpop.f32.mrf.mxu3 }
 0x1b1   :  { %v1161_v57 = vadd.f32 %v1160_v32, %v1132_v58  ;;  %1604 = vmatmul.bf16.gmra.mxu0 %v3118_v60  ;;  %1662 = vmatmul.bf16.gmra.mxu2 %v3118_v60 }
 0x1b2   :  { %v1105_v56 = vpop.f32.mrf.mxu1 }
 0x1b3   :  { %v1180_v7 = vmax.f32 %v1161_v57, 0.0  ;;  %v1106_v30 = vadd.f32 %v1105_v56, %v1077_v17  ;;  %v2464_v57 = vor.u32 %v2728_v1, %v2463_v0 }
 0x1b5   :  { %v3122_v10 = vpack.c.bf16 %v1180_v7, %v1178_v6  ;;  %v1181_v52 = vmax.f32 %v1106_v30, 0.0  ;;  %1743 = vmatpush.bf16.msra.mxu1 %v2464_v57  ;;  %v1083_v50 = vpop.f32.mrf.mxu0  ;;  %v1141_v8 = vpop.f32.mrf.mxu2 }
 0x1b6   :  { %v1084_v56 = vadd.f32 %v1083_v50, %v3093_v43  ;;  %v1142_v13 = vadd.f32 %v1141_v8, %v3098_v48  ;;  %v3146_v48 = vld [vmem:[%s3204_s6] sm:$0xf] }
 0x1b7   :  { %1633 = vmatmul.bf16.gmra.mxu1 %v3122_v10  ;;  %1691 = vmatmul.bf16.gmra.mxu3 %v3122_v10 }
 0x1b8   :  { %v1163_v23 = vpop.f32.mrf.mxu3 }
 0x1b9   :  { %v1164_v61 = vadd.f32 %v1163_v23, %v1135_v39 }
 0x1ba   :  { %v1107_v37 = vpop.f32.mrf.mxu1 }
 0x1bb   :  { %v1108_v46 = vadd.f32 %v1107_v37, %v1079_v29  ;;  %v1182_v2 = vmax.f32 %v1164_v61, 0.0 }
 0x1bd   :  { %v1183_v58 = vmax.f32 %v1108_v46, 0.0 }
 0x1bf   :  { %v1193_v62 = vpack.c.bf16 %v1183_v58, %v1181_v52 }
 0x1c0   :  { %v1165_v63 = vpop.f32.mrf.mxu3 }
 0x1c1   :  { %v1166_v32 = vadd.f32 %v1165_v63, %v1137_v59  ;;  %1609 = vmatmul.bf16.gmra.mxu0 %v1193_v62  ;;  %1667 = vmatmul.bf16.gmra.mxu2 %v1193_v62 }
 0x1c2   :  { %v1110_v54 = vpop.f32.mrf.mxu1 }
 0x1c3   :  { %v1184_v55 = vmax.f32 %v1166_v32, 0.0  ;;  %v1111_v4 = vadd.f32 %v1110_v54, %v1082_v51 }
 0x1c5   :  { %v1194_v44 = vpack.c.bf16 %v1184_v55, %v1182_v2  ;;  %v1185_v11 = vmax.f32 %v1111_v4, 0.0 }
 0x1c7   :  { %1638 = vmatmul.bf16.gmra.mxu1 %v1194_v44  ;;  %1696 = vmatmul.bf16.gmra.mxu3 %v1194_v44 }
 0x1c8   :  { %v1168_v3 = vpop.f32.mrf.mxu3 }
 0x1c9   :  { %v1169_v14 = vadd.f32 %v1168_v3, %v1140_v9 }
 0x1ca   :  { %v1112_v6 = vpop.f32.mrf.mxu1 }
 0x1cb   :  { %v1113_v7 = vadd.f32 %v1112_v6, %v1084_v56  ;;  %v1186_v18 = vmax.f32 %v1169_v14, 0.0 }
 0x1cd   :  { %v1187_v12 = vmax.f32 %v1113_v7, 0.0 }
 0x1cf   :  { %v1195_v15 = vpack.c.bf16 %v1187_v12, %v1185_v11 }
 0x1d0   :  { %v1170_v16 = vpop.f32.mrf.mxu3 }
 0x1d1   :  { %v1171_v17 = vadd.f32 %v1170_v16, %v1142_v13  ;;  %1614 = vmatmul.bf16.gmra.mxu0 %v1195_v15  ;;  %1672 = vmatmul.bf16.gmra.mxu2 %v1195_v15 }
 0x1d3   :  { %v1188_v19 = vmax.f32 %v1171_v17, 0.0 }
 0x1d5   :  { %v1196_v20 = vpack.c.bf16 %v1188_v19, %v1186_v18 }
 0x1d7   :  { %1643 = vmatmul.bf16.gmra.mxu1 %v1196_v20  ;;  %1701 = vmatmul.bf16.gmra.mxu3 %v1196_v20 }
 0x1e1   :  { %1715 = vmatmul.bf16.vlgmr.msra.gmra.mxu0 %v3103_v5  ;;  %1773 = vmatmul.bf16.vlgmr.msra.gmra.mxu2 %v3103_v5 }
 0x1e7   :  { %1744 = vmatmul.bf16.vlgmr.msra.gmra.mxu1 %v3107_v24  ;;  %1802 = vmatmul.bf16.vlgmr.msra.gmra.mxu3 %v3107_v24 }
 0x1f1   :  { %1720 = vmatmul.bf16.gmra.mxu0 %v3118_v60  ;;  %1778 = vmatmul.bf16.gmra.mxu2 %v3118_v60  ;;  %v3149_v60 = vperm.slane %v3146_v48, 0 }
 0x1f7   :  { %1749 = vmatmul.bf16.gmra.mxu1 %v3122_v10  ;;  %1807 = vmatmul.bf16.gmra.mxu3 %v3122_v10  ;;  %v3152_v10 = vperm.slane %v3146_v48, 1 }
 0x201   :  { %1725 = vmatmul.bf16.gmra.mxu0 %v1193_v62  ;;  %1783 = vmatmul.bf16.gmra.mxu2 %v1193_v62 }
 0x207   :  { %1754 = vmatmul.bf16.gmra.mxu1 %v1194_v44  ;;  %1812 = vmatmul.bf16.gmra.mxu3 %v1194_v44 }
 0x211   :  { %1730 = vmatmul.bf16.gmra.mxu0 %v1195_v15  ;;  %1788 = vmatmul.bf16.gmra.mxu2 %v1195_v15 }
 0x217   :  { %1759 = vmatmul.bf16.gmra.mxu1 %v1196_v20  ;;  %1817 = vmatmul.bf16.gmra.mxu3 %v1196_v20 }
 0x21e   :  { %v1600_v43 = vpop.f32.mrf.mxu0 }
 0x21f   :  { %v1601_v22 = vadd.f32 %v1600_v43, %v3149_v60 }
 0x224   :  { %v1629_v5 = vpop.f32.mrf.mxu1  ;;  %v1658_v24 = vpop.f32.mrf.mxu2 }
 0x225   :  { %v1659_v23 = vadd.f32 %v1658_v24, %v3152_v10  ;;  %v1630_v26 = vadd.f32 %v1629_v5, %v1601_v22 }
 0x226   :  { %v1602_v21 = vpop.f32.mrf.mxu0 }
 0x227   :  { %v1603_v33 = vadd.f32 %v1602_v21, %v3149_v60 }
 0x22a   :  { %v1687_v25 = vpop.f32.mrf.mxu3 }
 0x22b   :  { %v1688_v27 = vadd.f32 %v1687_v25, %v1659_v23 }
 0x22c   :  { %v1631_v28 = vpop.f32.mrf.mxu1  ;;  %v1660_v29 = vpop.f32.mrf.mxu2 }
 0x22d   :  { %v1823_v30 = vpack.c.bf16 %v1688_v27, %v1630_v26  ;;  %v1661_v34 = vadd.f32 %v1660_v29, %v3152_v10  ;;  %v1632_v36 = vadd.f32 %v1631_v28, %v1603_v33  ;;  %v3171_v33 = vperm.slane %v3146_v48, 2 }
 0x22e   :  { %v1605_v31 = vpop.f32.mrf.mxu0 }
 0x22f   :  { %1839 = vst [vmem:[#allocation13] sm:$0xff] %v1823_v30  ;;  %v1606_v46 = vadd.f32 %v1605_v31, %v3149_v60 }
 0x232   :  { %v1689_v35 = vpop.f32.mrf.mxu3 }
 0x233   :  { %v1690_v37 = vadd.f32 %v1689_v35, %v1661_v34  ;;  %v3174_v35 = vperm.slane %v3146_v48, 3 }
 0x234   :  { %v1634_v38 = vpop.f32.mrf.mxu1  ;;  %v1663_v40 = vpop.f32.mrf.mxu2 }
 0x235   :  { %v1825_v41 = vpack.c.bf16 %v1690_v37, %v1632_v36  ;;  %v1664_v47 = vadd.f32 %v1663_v40, %v3152_v10  ;;  %v1635_v49 = vadd.f32 %v1634_v38, %v1606_v46 }
 0x236   :  { %v1607_v42 = vpop.f32.mrf.mxu0 }
 0x237   :  { %1841 = vst [vmem:[#allocation13 + $0x10] sm:$0xff] %v1825_v41  ;;  %v1608_v62 = vadd.f32 %v1607_v42, %v3149_v60 }
 0x23a   :  { %v1692_v45 = vpop.f32.mrf.mxu3 }
 0x23b   :  { %v1693_v39 = vadd.f32 %v1692_v45, %v1664_v47 }
 0x23c   :  { %v1636_v52 = vpop.f32.mrf.mxu1  ;;  %v1665_v58 = vpop.f32.mrf.mxu2 }
 0x23d   :  { %v1827_v59 = vpack.c.bf16 %v1693_v39, %v1635_v49  ;;  %v1666_v63 = vadd.f32 %v1665_v58, %v3152_v10  ;;  %v1637_v0 = vadd.f32 %v1636_v52, %v1608_v62 }
 0x23e   :  { %v1610_v61 = vpop.f32.mrf.mxu0 }
 0x23f   :  { %1843 = vst [vmem:[#allocation13 + $0x20] sm:$0xff] %v1827_v59  ;;  %v1611_v55 = vadd.f32 %v1610_v61, %v3149_v60 }
 0x242   :  { %v1694_v32 = vpop.f32.mrf.mxu3 }
 0x243   :  { %v1695_v1 = vadd.f32 %v1694_v32, %v1666_v63 }
 0x244   :  { %v1639_v53 = vpop.f32.mrf.mxu1  ;;  %v1668_v54 = vpop.f32.mrf.mxu2 }
 0x245   :  { %v1829_v57 = vpack.c.bf16 %v1695_v1, %v1637_v0  ;;  %v1669_v44 = vadd.f32 %v1668_v54, %v3152_v10  ;;  %v1640_v51 = vadd.f32 %v1639_v53, %v1611_v55 }
 0x246   :  { %v1612_v2 = vpop.f32.mrf.mxu0 }
 0x247   :  { %1845 = vst [vmem:[#allocation13 + $0x30] sm:$0xff] %v1829_v57  ;;  %v1613_v8 = vadd.f32 %v1612_v2, %v3149_v60 }
 0x24a   :  { %v1697_v50 = vpop.f32.mrf.mxu3 }
 0x24b   :  { %v1698_v3 = vadd.f32 %v1697_v50, %v1669_v44 }
 0x24c   :  { %v1641_v56 = vpop.f32.mrf.mxu1  ;;  %v1670_v4 = vpop.f32.mrf.mxu2 }
 0x24d   :  { %v1831_v6 = vpack.c.bf16 %v1698_v3, %v1640_v51  ;;  %v1671_v9 = vadd.f32 %v1670_v4, %v3152_v10  ;;  %v1642_v12 = vadd.f32 %v1641_v56, %v1613_v8 }
 0x24e   :  { %v1615_v7 = vpop.f32.mrf.mxu0 }
 0x24f   :  { %1847 = vst [vmem:[#allocation13 + $0x40] sm:$0xff] %v1831_v6  ;;  %v1616_v18 = vadd.f32 %v1615_v7, %v3149_v60 }
 0x252   :  { %v1699_v11 = vpop.f32.mrf.mxu3 }
 0x253   :  { %v1700_v13 = vadd.f32 %v1699_v11, %v1671_v9 }
 0x254   :  { %v1644_v14 = vpop.f32.mrf.mxu1  ;;  %v1673_v15 = vpop.f32.mrf.mxu2 }
 0x255   :  { %v1833_v16 = vpack.c.bf16 %v1700_v13, %v1642_v12  ;;  %v1674_v19 = vadd.f32 %v1673_v15, %v3152_v10  ;;  %v1645_v43 = vadd.f32 %v1644_v14, %v1616_v18 }
 0x256   :  { %v1617_v17 = vpop.f32.mrf.mxu0 }
 0x257   :  { %1849 = vst [vmem:[#allocation13 + $0x50] sm:$0xff] %v1833_v16  ;;  %v1618_v25 = vadd.f32 %v1617_v17, %v3149_v60 }
 0x25a   :  { %v1702_v20 = vpop.f32.mrf.mxu3 }
 0x25b   :  { %v1703_v5 = vadd.f32 %v1702_v20, %v1674_v19 }
 0x25c   :  { %v1646_v24 = vpop.f32.mrf.mxu1  ;;  %v1675_v21 = vpop.f32.mrf.mxu2 }
 0x25d   :  { %v1835_v22 = vpack.c.bf16 %v1703_v5, %v1645_v43  ;;  %v1676_v26 = vadd.f32 %v1675_v21, %v3152_v10  ;;  %v1647_v28 = vadd.f32 %v1646_v24, %v1618_v25 }
 0x25e   :  { %v1716_v23 = vpop.f32.mrf.mxu0 }
 0x25f   :  { %1851 = vst [vmem:[#allocation13 + $0x60] sm:$0xff] %v1835_v22  ;;  %v1717_v37 = vadd.f32 %v1716_v23, %v3171_v33 }
 0x262   :  { %v1704_v27 = vpop.f32.mrf.mxu3 }
 0x263   :  { %v1705_v29 = vadd.f32 %v1704_v27, %v1676_v26 }
 0x264   :  { %v1745_v30 = vpop.f32.mrf.mxu1  ;;  %v1774_v31 = vpop.f32.mrf.mxu2 }
 0x265   :  { %v1837_v34 = vpack.c.bf16 %v1705_v29, %v1647_v28  ;;  %v1775_v60 = vadd.f32 %v1774_v31, %v3174_v35  ;;  %v1746_v10 = vadd.f32 %v1745_v30, %v1717_v37 }
 0x266   :  { %v1718_v36 = vpop.f32.mrf.mxu0 }
 0x267   :  { %1853 = vst [vmem:[#allocation13 + $0x70] sm:$0xff] %v1837_v34  ;;  %v1719_v45 = vadd.f32 %v1718_v36, %v3171_v33 }
 0x26a   :  { %v1803_v38 = vpop.f32.mrf.mxu3 }
 0x26b   :  { %v1804_v40 = vadd.f32 %v1803_v38, %v1775_v60 }
 0x26c   :  { %v1747_v41 = vpop.f32.mrf.mxu1  ;;  %v1776_v42 = vpop.f32.mrf.mxu2 }
 0x26d   :  { %v1824_v46 = vpack.c.bf16 %v1804_v40, %v1746_v10  ;;  %v1777_v49 = vadd.f32 %v1776_v42, %v3174_v35  ;;  %v1748_v39 = vadd.f32 %v1747_v41, %v1719_v45 }
 0x26e   :  { %v1721_v47 = vpop.f32.mrf.mxu0 }
 0x26f   :  { %1840 = vst [vmem:[#allocation13 + $0x8] sm:$0xff] %v1824_v46  ;;  %v1722_v63 = vadd.f32 %v1721_v47, %v3171_v33 }
 0x272   :  { %v1805_v48 = vpop.f32.mrf.mxu3 }
 0x273   :  { %v1806_v52 = vadd.f32 %v1805_v48, %v1777_v49 }
 0x274   :  { %v1750_v58 = vpop.f32.mrf.mxu1  ;;  %v1779_v59 = vpop.f32.mrf.mxu2 }
 0x275   :  { %v1826_v61 = vpack.c.bf16 %v1806_v52, %v1748_v39  ;;  %v1780_v32 = vadd.f32 %v1779_v59, %v3174_v35  ;;  %v1751_v1 = vadd.f32 %v1750_v58, %v1722_v63 }
 0x276   :  { %v1723_v62 = vpop.f32.mrf.mxu0 }
 0x277   :  { %1842 = vst [vmem:[#allocation13 + $0x18] sm:$0xff] %v1826_v61  ;;  %v1724_v44 = vadd.f32 %v1723_v62, %v3171_v33 }
 0x27a   :  { %v1808_v0 = vpop.f32.mrf.mxu3 }
 0x27b   :  { %v1809_v53 = vadd.f32 %v1808_v0, %v1780_v32 }
 0x27c   :  { %v1752_v54 = vpop.f32.mrf.mxu1  ;;  %v1781_v57 = vpop.f32.mrf.mxu2 }
 0x27d   :  { %v1828_v2 = vpack.c.bf16 %v1809_v53, %v1751_v1  ;;  %v1782_v50 = vadd.f32 %v1781_v57, %v3174_v35  ;;  %v1753_v3 = vadd.f32 %v1752_v54, %v1724_v44 }
 0x27e   :  { %v1726_v55 = vpop.f32.mrf.mxu0 }
 0x27f   :  { %1844 = vst [vmem:[#allocation13 + $0x28] sm:$0xff] %v1828_v2  ;;  %v1727_v8 = vadd.f32 %v1726_v55, %v3171_v33 }
 0x282   :  { %v1810_v51 = vpop.f32.mrf.mxu3 }
 0x283   :  { %v1811_v56 = vadd.f32 %v1810_v51, %v1782_v50 }
 0x284   :  { %v1755_v4 = vpop.f32.mrf.mxu1  ;;  %v1784_v6 = vpop.f32.mrf.mxu2 }
 0x285   :  { %v1830_v7 = vpack.c.bf16 %v1811_v56, %v1753_v3  ;;  %v1785_v9 = vadd.f32 %v1784_v6, %v3174_v35  ;;  %v1756_v13 = vadd.f32 %v1755_v4, %v1727_v8 }
 0x286   :  { %v1728_v11 = vpop.f32.mrf.mxu0 }
 0x287   :  { %1846 = vst [vmem:[#allocation13 + $0x38] sm:$0xff] %v1830_v7  ;;  %v1729_v18 = vadd.f32 %v1728_v11, %v3171_v33 }
 0x28a   :  { %v1813_v12 = vpop.f32.mrf.mxu3 }
 0x28b   :  { %v1814_v14 = vadd.f32 %v1813_v12, %v1785_v9 }
 0x28c   :  { %v1757_v15 = vpop.f32.mrf.mxu1  ;;  %v1786_v16 = vpop.f32.mrf.mxu2 }
 0x28d   :  { %v1832_v17 = vpack.c.bf16 %v1814_v14, %v1756_v13  ;;  %v1787_v19 = vadd.f32 %v1786_v16, %v3174_v35  ;;  %v1758_v43 = vadd.f32 %v1757_v15, %v1729_v18 }
 0x28e   :  { %v1731_v24 = vpop.f32.mrf.mxu0 }
 0x28f   :  { %1848 = vst [vmem:[#allocation13 + $0x48] sm:$0xff] %v1832_v17  ;;  %v1732_v25 = vadd.f32 %v1731_v24, %v3171_v33 }
 0x292   :  { %v1815_v20 = vpop.f32.mrf.mxu3 }
 0x293   :  { %v1816_v5 = vadd.f32 %v1815_v20, %v1787_v19 }
 0x294   :  { %v1789_v21 = vpop.f32.mrf.mxu2  ;;  %v1760_v23 = vpop.f32.mrf.mxu1 }
 0x295   :  { %v1834_v22 = vpack.c.bf16 %v1816_v5, %v1758_v43  ;;  %v1790_v26 = vadd.f32 %v1789_v21, %v3174_v35  ;;  %v1761_v28 = vadd.f32 %v1760_v23, %v1732_v25 }
 0x296   :  { %v1733_v31 = vpop.f32.mrf.mxu0 }
 0x297   :  { %1850 = vst [vmem:[#allocation13 + $0x58] sm:$0xff] %v1834_v22  ;;  %v1734_v37 = vadd.f32 %v1733_v31, %v3171_v33 }
 0x29a   :  { %v1818_v27 = vpop.f32.mrf.mxu3 }
 0x29b   :  { %v1819_v29 = vadd.f32 %v1818_v27, %v1790_v26 }
 0x29c   :  { %v1791_v34 = vpop.f32.mrf.mxu2  ;;  %v1762_v36 = vpop.f32.mrf.mxu1 }
 0x29d   :  { %v1836_v30 = vpack.c.bf16 %v1819_v29, %v1761_v28  ;;  %v1792_v60 = vadd.f32 %v1791_v34, %v3174_v35  ;;  %v1763_v10 = vadd.f32 %v1762_v36, %v1734_v37 }
 0x29f   :  { %1852 = vst [vmem:[#allocation13 + $0x68] sm:$0xff] %v1836_v30 }
 0x2a2   :  { %v1820_v38 = vpop.f32.mrf.mxu3 }
 0x2a3   :  { %v1821_v40 = vadd.f32 %v1820_v38, %v1792_v60 }
 0x2a5   :  { %v1838_v41 = vpack.c.bf16 %v1821_v40, %v1763_v10 }
 0x2a7   :  { %1854 = vst [vmem:[#allocation13 + $0x78] sm:$0xff] %v1838_v41 }
 0x2a8   :  { %1858 = vsyncadd [#allocation4], 256  ;;  %s1861_s9 = sshll.u32 %s3205_s7, 4  ;;  %s2956_s10 = smov [#allocation13]   ;;  %s1862_s9 = int_to_ptr.hbm [resolvable:$true] %s1861_s9 }
 0x2a9   :  { %s1859_s11 = sshll.u32 %s2956_s10, 4  ;;  %s1860_s11 = int_to_ptr.vmem [resolvable:$true] %s1859_s11 }
 0x2aa   :  { %1867 = dma.vmem_to_hbm [thread:$0]  %s1860_s11, 1792, %s1862_s9, [#allocation4], %s2951_s19, %s2951_s19, %s2952_s20  }
 0x2ab   :  { %2944 = dma.done.wait [#allocation4], 2048  }
 0x2ac   :  { %2945 = vsyncadd [#allocation4], 4294965248 }
 0x2ad   :  { %1872 = vsyncpa [#allocation3], 1 }
 0x2ae   :  { %1873 = vsyncpa [#allocation6], 1 }
 0x2af   :  { %1874 = vsyncpa [#allocation9], 1 }
 0x2b0   :  { %1875 = vsyncpa [#allocation12], 1 }
 0x2b1   :  { %1876 = vsyncpa [#allocation4], 1 }

</bundles_post_ra>
